<compile_context>
chip_gen: v7x
topology: tpu7x:2x2x1
jax: 0.10.0
libtpu: 0.0.40
codegen_flags: <defaults>
</compile_context>

<pallas_src>
import math
import functools

import jax
import jax.numpy as jnp
from jax.experimental import pallas as pl
from jax.experimental.pallas import tpu as pltpu


def _attn_map_kernel(s1_ref, s2_ref, adj_ref, out_ref, *, use_mask):
    # Pure VPU elementwise tile: broadcast-add + LeakyReLU + (mask) + scale.
    s1 = s1_ref[...]                          # (tm, 1)  per-row bias
    s2 = s2_ref[...]                          # (1, tn)  per-col bias
    adj = adj_ref[...]                        # (tm, tn)

    e = s1 + s2                               # broadcast -> (tm, tn)
    e = jnp.maximum(e, 0.2 * e)               # LeakyReLU(0.2) as a single max
    out = e * (adj + 1.0)
    if use_mask:
        # Where adj <= 0 the reference computes 0 * (adj + 1) = 0.
        out = jnp.where(adj > 0, out, 0.0)
    out_ref[...] = out


def node_attn_map(X, A, W, a, *, use_mask=False, tile_m=512, tile_n=2048):
    """Pallas implementation of NodeAttnMap.forward.

    X: (N, in_features) f32, A: (N, N) f32, W: (in_features, nhid) f32,
    a: (2*nhid, 1) f32  ->  (N, N) f32
    """
    N, _ = X.shape
    nhid = W.shape[1]

    # Fold the parameters:  (X @ W) @ a_k == X @ (W @ a_k).  Trivial O(N*F)
    # work -> plain XLA dot, no Pallas launch / no lane-sparse store.
    a12 = jnp.concatenate([a[:nhid, :], a[nhid:, :]], axis=1)     # (nhid, 2)
    v = jnp.dot(W.astype(jnp.float32), a12.astype(jnp.float32))   # (F, 2)
    s = jnp.dot(X.astype(jnp.float32), v)                         # (N, 2)
    s1 = s[:, 0:1]                                                # (N, 1) row bias
    s2 = s[:, 1].reshape(1, N)                                    # (1, N) col bias

    # Tile sizes: lane-dense output tiles, clamped to the full dim for small N
    # (block == full array dim is always legal; otherwise keep (8,128)-aligned
    # tiles and let Pallas mask the ragged edge blocks).
    tile_m = min(tile_m, N)
    tile_n = min(tile_n, N)
    if tile_m < N:
        tile_m = max(8, (tile_m // 8) * 8)
    if tile_n < N:
        tile_n = max(128, (tile_n // 128) * 128)

    grid = (pl.cdiv(N, tile_m), pl.cdiv(N, tile_n))

    kernel = functools.partial(_attn_map_kernel, use_mask=use_mask)
    out = pl.pallas_call(
        kernel,
        out_shape=jax.ShapeDtypeStruct((N, N), jnp.float32),
        grid=grid,
        in_specs=[
            pl.BlockSpec((tile_m, 1), lambda i, j: (i, 0)),        # row bias
            pl.BlockSpec((1, tile_n), lambda i, j: (0, j)),        # col bias
            pl.BlockSpec((tile_m, tile_n), lambda i, j: (i, j)),   # adjacency
        ],
        out_specs=pl.BlockSpec((tile_m, tile_n), lambda i, j: (i, j)),
        compiler_params=pltpu.CompilerParams(
            dimension_semantics=("parallel", "parallel"),
            vmem_limit_bytes=48 << 20,
        ),
    )(s1, s2, A.astype(jnp.float32))

    return out


def _xavier_uniform(key, shape, gain):
    fan_in, fan_out = shape[0], shape[1]
    bound = gain * math.sqrt(6.0 / (fan_in + fan_out))
    return jax.random.uniform(key, shape, jnp.float32, -bound, bound)


def _reference(X, A, W, a, use_mask=False):
    nhid = W.shape[1]
    Wh = X @ W
    Wh1 = Wh @ a[:nhid, :]
    Wh2 = Wh @ a[nhid:, :]
    e = Wh1 + Wh2.T
    e = jnp.where(e > 0, e, 0.2 * e)
    if use_mask:
        e = jnp.where(A > 0, e, jnp.zeros_like(e))
    return e * (A + 1.0)


if __name__ == "__main__":
    # Small shapes consistent with the module; N not a tile multiple so both
    # the single-block (clamped-tile) path and the multi-tile ragged-edge
    # path are exercised.
    N, in_features, nhid = 300, 48, 32

    key = jax.random.PRNGKey(0)
    k_w, k_a, k_x, k_adj = jax.random.split(key, 4)

    W = _xavier_uniform(k_w, (in_features, nhid), gain=1.414)
    a = _xavier_uniform(k_a, (2 * nhid, 1), gain=1.414)

    X = jax.random.normal(k_x, (N, in_features), jnp.float32)
    A = (jax.random.uniform(k_adj, (N, N), jnp.float32) > 0.7).astype(jnp.float32)

    ok = True

    # Default (large, clamped) tiles, no mask.
    out = jax.block_until_ready(node_attn_map(X, A, W, a, use_mask=False))
    ref = _reference(X, A, W, a, use_mask=False)
    assert out.shape == (N, N)
    ok &= bool(jnp.allclose(out, ref, atol=1e-4, rtol=1e-4))

    # Small tiles -> 3x3 grid with ragged edge blocks, masked variant.
    out = jax.block_until_ready(
        node_attn_map(X, A, W, a, use_mask=True, tile_m=128, tile_n=128))
    ref = _reference(X, A, W, a, use_mask=True)
    assert out.shape == (N, N)
    ok &= bool(jnp.allclose(out, ref, atol=1e-4, rtol=1e-4))

    assert ok
    print("KERNEL_OK")
</pallas_src>

<mosaic_0001>
module attributes {stable_mosaic.version = 11 : i64} {
  func.func @_attn_map_kernel(%arg0: i32, %arg1: i32, %arg2: memref<300x1xf32, #tpu.memory_space<vmem>>, %arg3: memref<1x300xf32, #tpu.memory_space<vmem>>, %arg4: memref<300x300xf32, #tpu.memory_space<vmem>>, %arg5: memref<300x300xf32, #tpu.memory_space<vmem>>) attributes {dimension_semantics = [#tpu.dimension_semantics<parallel>, #tpu.dimension_semantics<parallel>], iteration_bounds = array<i64: 1, 1>, scalar_prefetch = 0 : i64, scratch_operands = 0 : i64, tpu.core_type = #tpu.core_type<tc>, window_params = [{transform_indices = @transform_0, window_bounds = array<i64: 300, 1>}, {transform_indices = @transform_1, window_bounds = array<i64: 1, 300>}, {transform_indices = @transform_2, window_bounds = array<i64: 300, 300>}, {transform_indices = @transform_3, window_bounds = array<i64: 300, 300>}]} {
    %c0 = arith.constant 0 : index
    %c0_0 = arith.constant 0 : index
    %0 = vector.load %arg2[%c0, %c0_0] : memref<300x1xf32, #tpu.memory_space<vmem>>, vector<300x1xf32>
    %c0_1 = arith.constant 0 : index
    %c0_2 = arith.constant 0 : index
    %1 = vector.load %arg3[%c0_1, %c0_2] : memref<1x300xf32, #tpu.memory_space<vmem>>, vector<1x300xf32>
    %c0_3 = arith.constant 0 : index
    %c0_4 = arith.constant 0 : index
    %2 = vector.load %arg4[%c0_3, %c0_4] : memref<300x300xf32, #tpu.memory_space<vmem>>, vector<300x300xf32>
    %3 = vector.broadcast %0 : vector<300x1xf32> to vector<300x300xf32>
    %4 = vector.broadcast %1 : vector<1x300xf32> to vector<300x300xf32>
    %5 = arith.addf %3, %4 : vector<300x300xf32>
    %cst = arith.constant 2.000000e-01 : f32
    %6 = vector.broadcast %cst : f32 to vector<300x300xf32>
    %7 = arith.mulf %6, %5 : vector<300x300xf32>
    %8 = arith.maximumf %5, %7 : vector<300x300xf32>
    %cst_5 = arith.constant 1.000000e+00 : f32
    %9 = vector.broadcast %cst_5 : f32 to vector<300x300xf32>
    %10 = arith.addf %2, %9 : vector<300x300xf32>
    %11 = arith.mulf %8, %10 : vector<300x300xf32>
    %c0_6 = arith.constant 0 : index
    %c0_7 = arith.constant 0 : index
    %12 = vector.load %arg5[%c0_6, %c0_7] : memref<300x300xf32, #tpu.memory_space<vmem>>, vector<300x300xf32>
    tpu.vector_store %arg5[%c0_6, %c0_7], %11 {strides = array<i32>} : memref<300x300xf32, #tpu.memory_space<vmem>>, vector<300x300xf32>,
    return
  }
  func.func @transform_0(%arg0: i32, %arg1: i32) -> (i32, i32) {
    %c0_i32 = arith.constant 0 : i32
    %c0_i32_0 = arith.constant 0 : i32
    return %arg0, %c0_i32 : i32, i32
  }
  func.func @transform_1(%arg0: i32, %arg1: i32) -> (i32, i32) {
    %c0_i32 = arith.constant 0 : i32
    %c0_i32_0 = arith.constant 0 : i32
    return %c0_i32, %arg1 : i32, i32
  }
  func.func @transform_2(%arg0: i32, %arg1: i32) -> (i32, i32) {
    %c0_i32 = arith.constant 0 : i32
    return %arg0, %arg1 : i32, i32
  }
  func.func @transform_3(%arg0: i32, %arg1: i32) -> (i32, i32) {
    %c0_i32 = arith.constant 0 : i32
    return %arg0, %arg1 : i32, i32
  }
}

</mosaic_0001>

<bundles_post_ra>
// kernel: tpu_custom_call.1
= control target key start
LH: loop header
LB: loop body
LE: loop exit
PB: predicated region body
PF: predicated region fallthrough
CT: control target
= control target key end

     0   :  { %8 = vsyncpa [#allocation3], 0  ;;  %s1823_s0 = inlined_call_operand.vmem [shape: f32[300,1], index: 0, kind: input, shape index: {}]   ;;  %s1824_s1 = inlined_call_operand.vmem [shape: f32[1,300], index: 1, kind: input, shape index: {}]   ;;  %s1825_s2 = inlined_call_operand.hbm [shape: f32[300,300], index: 2, kind: input, shape index: {}]   ;;  %s1826_s3 = inlined_call_operand.hbm [shape: f32[300,300], index: 3, kind: output, shape index: {}]  }
   0x1   :  { %9 = vsyncpa [#allocation4], 0  ;;  %s1146_s12 = smov [#allocation2]   ;;  %s1098_s16 = scalar_lea.hbm %s1825_s2, 14592 }
   0x2   :  { %s19_s13 = sshll.u32 %s1146_s12, 4  ;;  %p1099_p0 = scmp.ne.s32.totalorder %s1825_s2, %s1098_s16  ;;  %s20_s13 = int_to_ptr.vmem [resolvable:$true] %s19_s13 }
   0x3   :  { %p1102_p1 = scmp.lt.u32.totalorder %s1098_s16, %s1825_s2 }
   0x5   :  { %p1104_p2 = pnand %p1102_p1, %p1099_p0 }
   0x7   :  { %1107 = shalt.err (!%p1104_p2)
}
   0x8   :  { %s1108_s21 = scalar_lea.vmem %s20_s13, 14592  ;;  %p1113_p4 = scmp.lt.s32.totalorder %s20_s13, %s20_s13 }
   0x9   :  { %p1109_p3 = scmp.ne.s32.totalorder %s20_s13, %s1108_s21  ;;  %p1114_p5 = scmp.lt.s32.totalorder %s1108_s21, %s1108_s21 }
   0xb   :  { %p1115_p6 = por %p1114_p5, %p1113_p4 }
   0xd   :  { %p1116_p7 = pnand %p1115_p6, %p1109_p3 }
   0xf   :  { %1119 = shalt.err (!%p1116_p7)
}
  0x10   :  { %s1147_s22 = smov 384   ;;  %s1148_s23 = smov 24  }
  0x11   :  { %25 = dma.hbm_to_vmem [thread:$0]  %s1825_s2, 14592, %s20_s13, [#allocation3], %s1147_s22, %s1147_s22, %s1148_s23  }
  0x12   :  { %1142 = dma.done.wait [#allocation3], 14592  }
  0x13   :  { %1143 = vsyncadd [#allocation3], 4294952704  ;;  %v1149_v0 = vmov 0   ;;  %v31_v1 = vld [vmem:[%s1823_s0 + $0x10] sm:$0xff]  ;;  %v29_v2 = vld [vmem:[%s1823_s0] sm:$0xff]  ;;  %v373_v39 = vlaneseq  ;;  %vm960_vm0 = vcmask 359424  }
  0x14   :  { %1097 = vset.pattern.permute.xlu1 %v1149_v0  ;;  %1096 = vset.pattern.permute.xlu0 %v1149_v0  ;;  %v32_v3 = vld [vmem:[%s1823_s0 + $0x18] sm:$0xff]  ;;  %v30_v4 = vld [vmem:[%s1823_s0 + $0x8] sm:$0xff]  ;;  %v33_v6 = vld [vmem:[%s1823_s0 + $0x20] sm:$0xff]  ;;  %vm1072_vm1 = vcmask 355328  }
  0x15   :  { %194 = vperm.xlu1 %1097, %v31_v1   ;;  %184 = vperm.xlu0 %1096, %v29_v2   ;;  %v34_v5 = vld [vmem:[%s1823_s0 + $0x28] sm:$0xff]  ;;  %v36_v7 = vld [vmem:[%s1823_s0 + $0x38] sm:$0xff]  ;;  %v35_v8 = vld [vmem:[%s1823_s0 + $0x30] sm:$0xff]  ;;  %v1300_v40 = vshrl.u32 %v373_v39, 7 }
  0x16   :  { %v38_v9 = vld [vmem:[%s1823_s0 + $0x48] sm:$0xff]  ;;  %v37_v10 = vld [vmem:[%s1823_s0 + $0x40] sm:$0xff]  ;;  %v40_v11 = vld [vmem:[%s1823_s0 + $0x58] sm:$0xff] }
  0x17   :  { %v39_v12 = vld [vmem:[%s1823_s0 + $0x50] sm:$0xff]  ;;  %v42_v13 = vld [vmem:[%s1823_s0 + $0x68] sm:$0xff]  ;;  %v41_v14 = vld [vmem:[%s1823_s0 + $0x60] sm:$0xff] }
  0x18   :  { %v44_v15 = vld [vmem:[%s1823_s0 + $0x78] sm:$0xff]  ;;  %v43_v16 = vld [vmem:[%s1823_s0 + $0x70] sm:$0xff]  ;;  %v46_v17 = vld [vmem:[%s1823_s0 + $0x88] sm:$0xff] }
  0x19   :  { %199 = vperm.xlu1 %1097, %v32_v3   ;;  %189 = vperm.xlu0 %1096, %v30_v4   ;;  %v45_v18 = vld [vmem:[%s1823_s0 + $0x80] sm:$0xff]  ;;  %v48_v19 = vld [vmem:[%s1823_s0 + $0x98] sm:$0xff]  ;;  %v47_v20 = vld [vmem:[%s1823_s0 + $0x90] sm:$0xff] }
  0x1a   :  { %v50_v21 = vld [vmem:[%s1823_s0 + $0xa8] sm:$0xff]  ;;  %v49_v22 = vld [vmem:[%s1823_s0 + $0xa0] sm:$0xff]  ;;  %v52_v23 = vld [vmem:[%s1823_s0 + $0xb8] sm:$0xff] }
  0x1b   :  { %v51_v24 = vld [vmem:[%s1823_s0 + $0xb0] sm:$0xff]  ;;  %v54_v25 = vld [vmem:[%s1823_s0 + $0xc8] sm:$0xff]  ;;  %v53_v26 = vld [vmem:[%s1823_s0 + $0xc0] sm:$0xff] }
  0x1c   :  { %v56_v27 = vld [vmem:[%s1823_s0 + $0xd8] sm:$0xff]  ;;  %v55_v28 = vld [vmem:[%s1823_s0 + $0xd0] sm:$0xff]  ;;  %v58_v29 = vld [vmem:[%s1823_s0 + $0xe8] sm:$0xff] }
  0x1d   :  { %209 = vperm.xlu1 %1097, %v34_v5   ;;  %204 = vperm.xlu0 %1096, %v33_v6   ;;  %v57_v30 = vld [vmem:[%s1823_s0 + $0xe0] sm:$0xff]  ;;  %v60_v31 = vld [vmem:[%s1823_s0 + $0xf8] sm:$0xff]  ;;  %v59_v32 = vld [vmem:[%s1823_s0 + $0xf0] sm:$0xff] }
  0x1e   :  { %v62_v33 = vld [vmem:[%s1823_s0 + $0x108] sm:$0xff]  ;;  %v61_v34 = vld [vmem:[%s1823_s0 + $0x100] sm:$0xff]  ;;  %v64_v35 = vld [vmem:[%s1823_s0 + $0x118] sm:$0xff] }
  0x1f   :  { %v63_v36 = vld [vmem:[%s1823_s0 + $0x110] sm:$0xff]  ;;  %v66_v37 = vld [vmem:[%s1823_s0 + $0x128] sm:$0xf]  ;;  %v65_v38 = vld [vmem:[%s1823_s0 + $0x120] sm:$0xff] }
  0x20   :  { %v74_v41 = vld [vmem:[#allocation2 + $0x30] sm:$0xff]  ;;  %v75_v42 = vld [vmem:[#allocation2 + $0x38] sm:$0xff]  ;;  %v76_v43 = vld [vmem:[#allocation2 + $0x40] sm:$0xff] }
  0x21   :  { %219 = vperm.xlu1 %1097, %v36_v7   ;;  %214 = vperm.xlu0 %1096, %v35_v8   ;;  %v68_v44 = vld [vmem:[#allocation2] sm:$0xff]  ;;  %v69_v45 = vld [vmem:[#allocation2 + $0x8] sm:$0xff]  ;;  %v70_v48 = vld [vmem:[#allocation2 + $0x10] sm:$0xff]  ;;  %v1305_v52 = vadd.f32 1.0, %v74_v41  ;;  %v1307_v53 = vadd.f32 1.0, %v75_v42  ;;  %v1309_v57 = vadd.f32 1.0, %v76_v43 }
  0x22   :  { %v77_v49 = vld [vmem:[#allocation2 + $0x48] sm:$0xff]  ;;  %v78_v50 = vld [vmem:[#allocation2 + $0x50] sm:$0xff]  ;;  %v79_v54 = vld [vmem:[#allocation2 + $0x58] sm:$0xff]  ;;  %v1311_v58 = vadd.f32 1.0, %v68_v44  ;;  %v1313_v59 = vadd.f32 1.0, %v69_v45  ;;  %v1315_v63 = vadd.f32 1.0, %v70_v48 }
  0x23   :  { %v71_v55 = vld [vmem:[#allocation2 + $0x18] sm:$0xff]  ;;  %v72_v56 = vld [vmem:[#allocation2 + $0x20] sm:$0xff]  ;;  %v73_v60 = vld [vmem:[#allocation2 + $0x28] sm:$0xff]  ;;  %v1317_v0 = vadd.f32 1.0, %v77_v49  ;;  %v1319_v1 = vadd.f32 1.0, %v78_v50  ;;  %v1321_v5 = vadd.f32 1.0, %v79_v54 }
  0x24   :  { %v83_v61 = vld [vmem:[#allocation2 + $0x78] sm:$0xff]  ;;  %v84_v62 = vld [vmem:[#allocation2 + $0x80] sm:$0xff]  ;;  %v85_v2 = vld [vmem:[#allocation2 + $0x88] sm:$0xff]  ;;  %v1323_v6 = vadd.f32 1.0, %v71_v55  ;;  %v1325_v7 = vadd.f32 1.0, %v72_v56 }
  0x25   :  { %229 = vperm.xlu1 %1097, %v38_v9   ;;  %224 = vperm.xlu0 %1096, %v37_v10   ;;  %v80_v3 = vld [vmem:[#allocation2 + $0x60] sm:$0xff]  ;;  %v81_v4 = vld [vmem:[#allocation2 + $0x68] sm:$0xff]  ;;  %v82_v8 = vld [vmem:[#allocation2 + $0x70] sm:$0xff] }
  0x26   :  { %v89_v9 = vld [vmem:[#allocation2 + $0xa8] sm:$0xff]  ;;  %v90_v10 = vld [vmem:[#allocation2 + $0xb0] sm:$0xff]  ;;  %v99_v41 = vld [vmem:[#allocation2 + $0xf8] sm:$0xff] }
  0x27   :  { %v98_v39 = vld [vmem:[#allocation2 + $0xf0] sm:$0xff]  ;;  %v100_v45 = vld [vmem:[#allocation2 + $0x100] sm:$0xff]  ;;  %v107_v48 = vld [vmem:[#allocation2 + $0x138] sm:$0xff] }
  0x28   :  { %v108_v49 = vld [vmem:[#allocation2 + $0x140] sm:$0xff]  ;;  %v109_v56 = vld [vmem:[#allocation2 + $0x148] sm:$0xff]  ;;  %v126_v47 = vld [vmem:[#allocation2 + $0x1d0] sm:$0xff] }
  0x29   :  { %239 = vperm.xlu1 %1097, %v40_v11   ;;  %234 = vperm.xlu0 %1096, %v39_v12   ;;  %v1327_v11 = vadd.f32 1.0, %v73_v60  ;;  %v1329_v12 = vadd.f32 1.0, %v83_v61  ;;  %v104_v60 = vld [vmem:[#allocation2 + $0x120] sm:$0xff]  ;;  %v105_v61 = vld [vmem:[#allocation2 + $0x128] sm:$0xff] }
  0x2a   :  { %v125_v51 = vld [vmem:[#allocation2 + $0x1c8] sm:$0xff] }
  0x2d   :  { %249 = vperm.xlu1 %1097, %v42_v13   ;;  %244 = vperm.xlu0 %1096, %v41_v14   ;;  %v1331_v13 = vadd.f32 1.0, %v84_v62  ;;  %v91_v14 = vld [vmem:[#allocation2 + $0xb8] sm:$0xff] }
  0x31   :  { %259 = vperm.xlu1 %1097, %v44_v15   ;;  %254 = vperm.xlu0 %1096, %v43_v16   ;;  %v86_v15 = vld [vmem:[#allocation2 + $0x90] sm:$0xff]  ;;  %v87_v16 = vld [vmem:[#allocation2 + $0x98] sm:$0xff] }
  0x35   :  { %269 = vperm.xlu1 %1097, %v46_v17   ;;  %264 = vperm.xlu0 %1096, %v45_v18   ;;  %v1333_v17 = vadd.f32 1.0, %v85_v2  ;;  %v1335_v18 = vadd.f32 1.0, %v80_v3  ;;  %v1371_v2 = vadd.f32 1.0, %v98_v39  ;;  %v1373_v3 = vadd.f32 1.0, %v99_v41  ;;  %v121_v41 = vld [vmem:[#allocation2 + $0x1a8] sm:$0xff] }
  0x39   :  { %279 = vperm.xlu1 %1097, %v48_v19   ;;  %274 = vperm.xlu0 %1096, %v47_v20   ;;  %v1337_v19 = vadd.f32 1.0, %v81_v4  ;;  %v88_v20 = vld [vmem:[#allocation2 + $0xa0] sm:$0xff]  ;;  %v106_v4 = vld [vmem:[#allocation2 + $0x130] sm:$0xff] }
  0x3d   :  { %289 = vperm.xlu1 %1097, %v50_v21   ;;  %284 = vperm.xlu0 %1096, %v49_v22   ;;  %v95_v21 = vld [vmem:[#allocation2 + $0xd8] sm:$0xff]  ;;  %v96_v22 = vld [vmem:[#allocation2 + $0xe0] sm:$0xff] }
  0x41   :  { %299 = vperm.xlu1 %1097, %v52_v23   ;;  %294 = vperm.xlu0 %1096, %v51_v24   ;;  %v1339_v23 = vadd.f32 1.0, %v82_v8  ;;  %v1341_v24 = vadd.f32 1.0, %v89_v9  ;;  %v113_v8 = vld [vmem:[#allocation2 + $0x168] sm:$0xff]  ;;  %v114_v9 = vld [vmem:[#allocation2 + $0x170] sm:$0xff] }
  0x42   :  { %v1391_v39 = vadd.f32 1.0, %v114_v9  ;;  %v127_v9 = vld [vmem:[#allocation2 + $0x1d8] sm:$0xff] }
  0x44   :  { %1835 = vst [vmem:[#allocation16_spill] sm:$0xff] %v1391_v39  ;;  %v122_v39 = vld [vmem:[#allocation2 + $0x1b0] sm:$0xff] }
  0x45   :  { %309 = vperm.xlu1 %1097, %v54_v25   ;;  %304 = vperm.xlu0 %1096, %v53_v26   ;;  %v1343_v25 = vadd.f32 1.0, %v90_v10  ;;  %v97_v26 = vld [vmem:[#allocation2 + $0xe8] sm:$0xff]  ;;  %v1375_v10 = vadd.f32 1.0, %v100_v45  ;;  %v116_v45 = vld [vmem:[#allocation2 + $0x180] sm:$0xff] }
  0x46   :  { %v1357_v42 = vadd.f32 1.0, %v97_v26  ;;  %v1383_v26 = vadd.f32 1.0, %v104_v60 }
  0x47   :  { %1827 = vst [vmem:[#allocation8_spill] sm:$0xff] %v1375_v10 }
  0x48   :  { %1831 = vst [vmem:[#allocation12_spill] sm:$0xff] %v1383_v26 }
  0x49   :  { %319 = vperm.xlu1 %1097, %v56_v27   ;;  %314 = vperm.xlu0 %1096, %v55_v28   ;;  %v92_v27 = vld [vmem:[#allocation2 + $0xc0] sm:$0xff]  ;;  %v93_v28 = vld [vmem:[#allocation2 + $0xc8] sm:$0xff] }
  0x4a   :  { %v1359_v43 = vadd.f32 1.0, %v92_v27  ;;  %v1361_v44 = vadd.f32 1.0, %v93_v28  ;;  %v1385_v27 = vadd.f32 1.0, %v105_v61  ;;  %v112_v28 = vld [vmem:[#allocation2 + $0x160] sm:$0xff]  ;;  %v118_v61 = vld [vmem:[#allocation2 + $0x190] sm:$0xff] }
  0x4b   :  { %v1399_v46 = vadd.f32 1.0, %v112_v28  ;;  %v1413_v28 = vadd.f32 1.0, %v125_v51 }
  0x4c   :  { %1832 = vst [vmem:[#allocation13_spill] sm:$0xff] %v1385_v27 }
  0x4d   :  { %329 = vperm.xlu1 %1097, %v58_v29   ;;  %324 = vperm.xlu0 %1096, %v57_v30   ;;  %v1345_v29 = vadd.f32 1.0, %v91_v14  ;;  %v1347_v30 = vadd.f32 1.0, %v86_v15  ;;  %v1377_v14 = vadd.f32 1.0, %v107_v48  ;;  %v1379_v15 = vadd.f32 1.0, %v108_v49  ;;  %v117_v48 = vld [vmem:[#allocation2 + $0x188] sm:$0xff]  ;;  %1839 = vst [vmem:[#allocation20_spill] sm:$0xff] %v1399_v46 }
  0x4e   :  { %1846 = vst [vmem:[#allocation27_spill] sm:$0xff] %v1413_v28  ;;  %v1417_v46 = vadd.f32 1.0, %v127_v9  ;;  %v135_v28 = vld [vmem:[#allocation2 + $0x218] sm:$0xff] }
  0x4f   :  { %1828 = vst [vmem:[#allocation9_spill] sm:$0xff] %v1377_v14  ;;  %1829 = vst [vmem:[#allocation10_spill] sm:$0xff] %v1379_v15 }
  0x50   :  { %1848 = vst [vmem:[#allocation29_spill] sm:$0xff] %v1417_v46 }
  0x51   :  { %339 = vperm.xlu1 %1097, %v60_v31   ;;  %334 = vperm.xlu0 %1096, %v59_v32   ;;  %v1349_v31 = vadd.f32 1.0, %v87_v16  ;;  %v94_v32 = vld [vmem:[#allocation2 + $0xd0] sm:$0xff]  ;;  %v115_v16 = vld [vmem:[#allocation2 + $0x178] sm:$0xff] }
  0x52   :  { %v1363_v50 = vadd.f32 1.0, %v94_v32  ;;  %v119_v32 = vld [vmem:[#allocation2 + $0x198] sm:$0xff]  ;;  %v1393_v49 = vadd.f32 1.0, %v115_v16  ;;  %v1407_v16 = vadd.f32 1.0, %v116_v45 }
  0x54   :  { %1836 = vst [vmem:[#allocation17_spill] sm:$0xff] %v1393_v49  ;;  %1843 = vst [vmem:[#allocation24_spill] sm:$0xff] %v1407_v16  ;;  %v1411_v49 = vadd.f32 1.0, %v118_v61  ;;  %v138_v16 = vld [vmem:[#allocation2 + $0x230] sm:$0xff] }
  0x55   :  { %349 = vperm.xlu1 %1097, %v62_v33   ;;  %344 = vperm.xlu0 %1096, %v61_v34   ;;  %v101_v33 = vld [vmem:[#allocation2 + $0x108] sm:$0xff]  ;;  %v102_v34 = vld [vmem:[#allocation2 + $0x110] sm:$0xff] }
  0x56   :  { %v1365_v54 = vadd.f32 1.0, %v101_v33  ;;  %v1367_v55 = vadd.f32 1.0, %v102_v34  ;;  %v120_v33 = vld [vmem:[#allocation2 + $0x1a0] sm:$0xff]  ;;  %v1387_v34 = vadd.f32 1.0, %v106_v4  ;;  %v1401_v4 = vadd.f32 1.0, %v119_v32  ;;  %1845 = vst [vmem:[#allocation26_spill] sm:$0xff] %v1411_v49 }
  0x57   :  { %v1415_v32 = vadd.f32 1.0, %v126_v47  ;;  %v139_v47 = vld [vmem:[#allocation2 + $0x238] sm:$0xff] }
  0x58   :  { %1833 = vst [vmem:[#allocation14_spill] sm:$0xff] %v1387_v34  ;;  %1840 = vst [vmem:[#allocation21_spill] sm:$0xff] %v1401_v4  ;;  %v1405_v34 = vadd.f32 1.0, %v121_v41  ;;  %v129_v4 = vld [vmem:[#allocation2 + $0x1e8] sm:$0xff]  ;;  %v1419_v41 = vadd.f32 1.0, %v122_v39 }
  0x59   :  { %359 = vperm.xlu1 %1097, %v64_v35   ;;  %354 = vperm.xlu0 %1096, %v63_v36   ;;  %v1351_v35 = vadd.f32 1.0, %v88_v20  ;;  %v1353_v36 = vadd.f32 1.0, %v95_v21  ;;  %v110_v20 = vld [vmem:[#allocation2 + $0x150] sm:$0xff]  ;;  %v111_v21 = vld [vmem:[#allocation2 + $0x158] sm:$0xff]  ;;  %1847 = vst [vmem:[#allocation28_spill] sm:$0xff] %v1415_v32  ;;  %v1433_v39 = vadd.f32 1.0, %v129_v4 }
  0x5a   :  { %v1397_v60 = vadd.f32 1.0, %v111_v21  ;;  %1842 = vst [vmem:[#allocation23_spill] sm:$0xff] %v1405_v34  ;;  %v124_v21 = vld [vmem:[#allocation2 + $0x1c0] sm:$0xff]  ;;  %1849 = vst [vmem:[#allocation30_spill] sm:$0xff] %v1419_v41  ;;  %v134_v32 = vld [vmem:[#allocation2 + $0x210] sm:$0xff] }
  0x5b   :  { %v1423_v34 = vadd.f32 1.0, %v124_v21  ;;  %1856 = vst [vmem:[#allocation37_spill] sm:$0xff] %v1433_v39  ;;  %v144_v41 = vld [vmem:[#allocation2 + $0x260] sm:$0xff]  ;;  %v142_v4 = vld [vmem:[#allocation2 + $0x250] sm:$0xff]  ;;  %v149_v39 = vld [vmem:[#allocation2 + $0x288] sm:$0xff] }
  0x5c   :  { %1838 = vst [vmem:[#allocation19_spill] sm:$0xff] %v1397_v60  ;;  %v131_v60 = vld [vmem:[#allocation2 + $0x1f8] sm:$0xff] }
  0x5d   :  { %369 = vperm.xlu1 %1097, %v66_v37   ;;  %364 = vperm.xlu0 %1096, %v65_v38   ;;  %v1355_v37 = vadd.f32 1.0, %v96_v22  ;;  %v103_v38 = vld [vmem:[#allocation2 + $0x118] sm:$0xff]  ;;  %v1381_v22 = vadd.f32 1.0, %v109_v56  ;;  %v1395_v56 = vadd.f32 1.0, %v110_v20  ;;  %v1409_v20 = vadd.f32 1.0, %v117_v48  ;;  %v130_v48 = vld [vmem:[#allocation2 + $0x1f0] sm:$0xff] }
  0x5e   :  { %v1369_v62 = vadd.f32 1.0, %v103_v38  ;;  %v1389_v38 = vadd.f32 1.0, %v113_v8  ;;  %v1403_v8 = vadd.f32 1.0, %v120_v33  ;;  %v133_v33 = vld [vmem:[#allocation2 + $0x208] sm:$0xff]  ;;  %1851 = vst [vmem:[#allocation32_spill] sm:$0xff] %v1423_v34  ;;  %v1425_v61 = vadd.f32 1.0, %v131_v60 }
  0x5f   :  { %1830 = vst [vmem:[#allocation11_spill] sm:$0xff] %v1381_v22  ;;  %1837 = vst [vmem:[#allocation18_spill] sm:$0xff] %v1395_v56  ;;  %v132_v56 = vld [vmem:[#allocation2 + $0x200] sm:$0xff]  ;;  %v1429_v49 = vadd.f32 1.0, %v133_v33  ;;  %v1435_v46 = vadd.f32 1.0, %v130_v48  ;;  %v1439_v60 = vadd.f32 1.0, %v138_v16 }
  0x60   :  { %1834 = vst [vmem:[#allocation15_spill] sm:$0xff] %v1389_v38  ;;  %1841 = vst [vmem:[#allocation22_spill] sm:$0xff] %v1403_v8  ;;  %v123_v38 = vld [vmem:[#allocation2 + $0x1b8] sm:$0xff]  ;;  %v128_v8 = vld [vmem:[#allocation2 + $0x1e0] sm:$0xff]  ;;  %v1427_v51 = vadd.f32 1.0, %v132_v56  ;;  %v1441_v34 = vadd.f32 1.0, %v139_v47 }
  0x61   :  { %1844 = vst [vmem:[#allocation25_spill] sm:$0xff] %v1409_v20  ;;  %v1421_v45 = vadd.f32 1.0, %v123_v38  ;;  %v137_v20 = vld [vmem:[#allocation2 + $0x228] sm:$0xff]  ;;  %1852 = vst [vmem:[#allocation33_spill] sm:$0xff] %v1425_v61  ;;  %v1431_v9 = vadd.f32 1.0, %v128_v8  ;;  %v136_v38 = vld [vmem:[#allocation2 + $0x220] sm:$0xff] }
  0x62   :  { %1853 = vst [vmem:[#allocation34_spill] sm:$0xff] %v1427_v51  ;;  %1854 = vst [vmem:[#allocation35_spill] sm:$0xff] %v1429_v49  ;;  %v1437_v21 = vadd.f32 1.0, %v137_v20  ;;  %v145_v56 = vld [vmem:[#allocation2 + $0x268] sm:$0xff]  ;;  %v140_v51 = vld [vmem:[#allocation2 + $0x240] sm:$0xff]  ;;  %v1443_v33 = vadd.f32 1.0, %v134_v32 }
  0x63   :  { %1850 = vst [vmem:[#allocation31_spill] sm:$0xff] %v1421_v45  ;;  %1855 = vst [vmem:[#allocation36_spill] sm:$0xff] %v1431_v9  ;;  %v143_v45 = vld [vmem:[#allocation2 + $0x258] sm:$0xff]  ;;  %v141_v61 = vld [vmem:[#allocation2 + $0x248] sm:$0xff]  ;;  %v1445_v8 = vadd.f32 1.0, %v135_v28  ;;  %v1447_v49 = vadd.f32 1.0, %v136_v38 }
  0x64   :  { %1857 = vst [vmem:[#allocation38_spill] sm:$0xff] %v1435_v46  ;;  %1858 = vst [vmem:[#allocation39_spill] sm:$0xff] %v1437_v21  ;;  %v150_v9 = vld [vmem:[#allocation2 + $0x290] sm:$0xff]  ;;  %v1449_v48 = vadd.f32 1.0, %v143_v45  ;;  %v1451_v20 = vadd.f32 1.0, %v144_v41  ;;  %v151_v16 = vld [vmem:[#allocation2 + $0x298] sm:$0xff] }
  0x65   :  { %1859 = vst [vmem:[#allocation40_spill] sm:$0xff] %v1439_v60  ;;  %1860 = vst [vmem:[#allocation41_spill] sm:$0xff] %v1441_v34  ;;  %v146_v60 = vld [vmem:[#allocation2 + $0x270] sm:$0xff]  ;;  %v147_v21 = vld [vmem:[#allocation2 + $0x278] sm:$0xff]  ;;  %v1453_v46 = vadd.f32 1.0, %v145_v56  ;;  %v1455_v47 = vadd.f32 1.0, %v140_v51 }
  0x66   :  { %1861 = vst [vmem:[#allocation42_spill] sm:$0xff] %v1443_v33  ;;  %1862 = vst [vmem:[#allocation43_spill] sm:$0xff] %v1445_v8  ;;  %v1457_v32 = vadd.f32 1.0, %v141_v61  ;;  %v148_v28 = vld [vmem:[#allocation2 + $0x280] sm:$0xff]  ;;  %v155_v8 = vld [vmem:[#allocation2 + $0x2b8] sm:$0xff]  ;;  %v1459_v34 = vadd.f32 1.0, %v142_v4 }
  0x67   :  { %1863 = vst [vmem:[#allocation44_spill] sm:$0xff] %v1447_v49  ;;  %1864 = vst [vmem:[#allocation45_spill] sm:$0xff] %v1449_v48  ;;  %v156_v33 = vld [vmem:[#allocation2 + $0x2c0] sm:$0xff]  ;;  %v1461_v38 = vadd.f32 1.0, %v149_v39  ;;  %v1463_v45 = vadd.f32 1.0, %v150_v9  ;;  %v157_v41 = vld [vmem:[#allocation2 + $0x2c8] sm:$0xff] }
  0x68   :  { %1865 = vst [vmem:[#allocation46_spill] sm:$0xff] %v1451_v20  ;;  %1866 = vst [vmem:[#allocation47_spill] sm:$0xff] %v1453_v46  ;;  %v152_v20 = vld [vmem:[#allocation2 + $0x2a0] sm:$0xff]  ;;  %v153_v48 = vld [vmem:[#allocation2 + $0x2a8] sm:$0xff]  ;;  %v1465_v49 = vadd.f32 1.0, %v151_v16  ;;  %v1467_v56 = vadd.f32 1.0, %v146_v60 }
  0x69   :  { %1867 = vst [vmem:[#allocation48_spill] sm:$0xff] %v1455_v47  ;;  %1868 = vst [vmem:[#allocation49_spill] sm:$0xff] %v1457_v32  ;;  %v1469_v51 = vadd.f32 1.0, %v147_v21  ;;  %v154_v61 = vld [vmem:[#allocation2 + $0x2b0] sm:$0xff]  ;;  %v161_v32 = vld [vmem:[#allocation2 + $0x2e8] sm:$0xff]  ;;  %v1474_v39 = vadd.f32 1.0, %v148_v28 }
  0x6a   :  { %1869 = vst [vmem:[#allocation50_spill] sm:$0xff] %v1459_v34  ;;  %1870 = vst [vmem:[#allocation51_spill] sm:$0xff] %v1461_v38  ;;  %v162_v47 = vld [vmem:[#allocation2 + $0x2f0] sm:$0xff]  ;;  %v1476_v9 = vadd.f32 1.0, %v155_v8  ;;  %v163_v38 = vld [vmem:[#allocation2 + $0x2f8] sm:$0xff]  ;;  %v1480_v60 = vadd.f32 1.0, %v157_v41 }
  0x6b   :  { %1871 = vst [vmem:[#allocation52_spill] sm:$0xff] %v1463_v45  ;;  %1872 = vst [vmem:[#allocation53_spill] sm:$0xff] %v1465_v49  ;;  %v67_v4 = vld [vmem:[%s1824_s1] sm:$0x7]  ;;  %v1478_v45 = vadd.f32 1.0, %v156_v33  ;;  %v159_v49 = vld [vmem:[#allocation2 + $0x2d8] sm:$0xff] }
  0x6c   :  { %1873 = vst [vmem:[#allocation54_spill] sm:$0xff] %v1467_v56  ;;  %1874 = vst [vmem:[#allocation55_spill] sm:$0xff] %v1469_v51  ;;  %v158_v16 = vld [vmem:[#allocation2 + $0x2d0] sm:$0xff]  ;;  %v1482_v21 = vadd.f32 1.0, %v152_v20  ;;  %v1484_v51 = vadd.f32 1.0, %v153_v48  ;;  %v160_v56 = vld [vmem:[#allocation2 + $0x2e0] sm:$0xff] }
  0x6d   :  { %1875 = vst [vmem:[#allocation56_spill] sm:$0xff] %v1474_v39  ;;  %1876 = vst [vmem:[#allocation57_spill] sm:$0xff] %v1476_v9  ;;  %v167_v34 = vld [vmem:[#allocation2 + $0x318] sm:$0xff]  ;;  %v168_v46 = vld [vmem:[#allocation2 + $0x320] sm:$0xff]  ;;  %v1486_v27 = vadd.f32 1.0, %v154_v61  ;;  %v1488_v28 = vadd.f32 1.0, %v161_v32 }
  0x6e   :  { %1877 = vst [vmem:[#allocation58_spill] sm:$0xff] %v1478_v45  ;;  %1878 = vst [vmem:[#allocation59_spill] sm:$0xff] %v1480_v60  ;;  %v1490_v8 = vadd.f32 1.0, %v162_v47  ;;  %v169_v33 = vld [vmem:[#allocation2 + $0x328] sm:$0xff]  ;;  %v164_v45 = vld [vmem:[#allocation2 + $0x300] sm:$0xff]  ;;  %v1492_v39 = vadd.f32 1.0, %v163_v38 }
  0x6f   :  { %1879 = vst [vmem:[#allocation60_spill] sm:$0xff] %v1482_v21  ;;  %1880 = vst [vmem:[#allocation61_spill] sm:$0xff] %v1484_v51  ;;  %v165_v9 = vld [vmem:[#allocation2 + $0x308] sm:$0xff]  ;;  %v1494_v41 = vadd.f32 1.0, %v158_v16  ;;  %v1496_v20 = vadd.f32 1.0, %v159_v49  ;;  %v166_v48 = vld [vmem:[#allocation2 + $0x310] sm:$0xff] }
  0x70   :  { %1881 = vst [vmem:[#allocation62_spill] sm:$0xff] %v1486_v27  ;;  %1882 = vst [vmem:[#allocation63_spill] sm:$0xff] %v1488_v28  ;;  %v173_v51 = vld [vmem:[#allocation2 + $0x348] sm:$0xff]  ;;  %v174_v21 = vld [vmem:[#allocation2 + $0x350] sm:$0xff]  ;;  %v1498_v60 = vadd.f32 1.0, %v160_v56  ;;  %v1500_v61 = vadd.f32 1.0, %v167_v34 }
  0x71   :  { %1883 = vst [vmem:[#allocation64_spill] sm:$0xff] %v1490_v8  ;;  %1884 = vst [vmem:[#allocation65_spill] sm:$0xff] %v1492_v39  ;;  %v1502_v32 = vadd.f32 1.0, %v168_v46  ;;  %v175_v47 = vld [vmem:[#allocation2 + $0x358] sm:$0xff]  ;;  %v170_v8 = vld [vmem:[#allocation2 + $0x330] sm:$0xff]  ;;  %v1890_v27 = vsub.s32 0, %v1300_v40 }
  0x72   :  { %1885 = vst [vmem:[#allocation66_spill] sm:$0xff] %v1494_v41  ;;  %1886 = vst [vmem:[#allocation67_spill] sm:$0xff] %v1496_v20  ;;  %v171_v28 = vld [vmem:[#allocation2 + $0x338] sm:$0xff]  ;;  %v1891_v16 = vsub.s32 1, %v1300_v40  ;;  %v1892_v20 = vsub.s32 2, %v1300_v40  ;;  %v1516_v56 = vadd.f32 1.0, %v169_v33 }
  0x73   :  { %1887 = vst [vmem:[#allocation68_spill] sm:$0xff] %v1498_v60  ;;  %1888 = vst [vmem:[#allocation69_spill] sm:$0xff] %v1500_v61  ;;  %v1506_v38 = vrot.slane %v67_v4, %v1890_v27  ;;  %v172_v34 = vld [vmem:[#allocation2 + $0x340] sm:$0xff]  ;;  %v179_v46 = vld [vmem:[#allocation2 + $0x378] sm:$0xf]  ;;  %v1518_v61 = vadd.f32 1.0, %v164_v45 }
  0x74   :  { %1889 = vst [vmem:[#allocation70_spill] sm:$0xff] %v1502_v32  ;;  %v1510_v49 = vrot.slane %v67_v4, %v1891_v16  ;;  %v1514_v41 = vrot.slane %v67_v4, %v1892_v20  ;;  %1893 = vst [vmem:[#allocation71_spill] sm:$0xff] %v1516_v56  ;;  %v180_v32 = vld [vmem:[#allocation2 + $0x380] sm:$0xf]  ;;  %v1520_v60 = vadd.f32 1.0, %v165_v9  ;;  %v1522_v27 = vadd.f32 1.0, %v166_v48 }
  0x75   :  { %1894 = vst [vmem:[#allocation72_spill] sm:$0xff] %v1518_v61  ;;  %v1524_v39 = vadd.f32 1.0, %v173_v51  ;;  %v1526_v16 = vadd.f32 1.0, %v174_v21  ;;  %v1528_v26 = vadd.f32 1.0, %v175_v47  ;;  %v1530_v40 = vadd.f32 1.0, %v170_v8  ;;  %v176_v33 = vld [vmem:[#allocation2 + $0x360] sm:$0xff] }
  0x76   :  { %1895 = vst [vmem:[#allocation73_spill] sm:$0xff] %v1520_v60  ;;  %1896 = vst [vmem:[#allocation74_spill] sm:$0xff] %v1522_v27  ;;  %v181_v4 = vld [vmem:[#allocation2 + $0x388] sm:$0xf]  ;;  %v1532_v22 = vadd.f32 1.0, %v171_v28  ;;  %v1534_v45 = vadd.f32 1.0, %v172_v34 }
  0x77   :  { %1897 = vst [vmem:[#allocation75_spill] sm:$0xff] %v1524_v39  ;;  %1898 = vst [vmem:[#allocation76_spill] sm:$0xff] %v1526_v16  ;;  %v1536_v9 = vadd.f32 1.0, %v179_v46  ;;  %v1538_v48 = vadd.f32 1.0, %v180_v32  ;;  %v1546_v28 = vadd.f32 1.0, %v181_v4  ;;  %v1548_v34 = vadd.f32 1.0, %v176_v33 }
  0x78   :  { %1899 = vst [vmem:[#allocation77_spill] sm:$0xff] %v1528_v26  ;;  %1900 = vst [vmem:[#allocation78_spill] sm:$0xff] %v1530_v40  ;;  %s1150_s1 = smov [#allocation5]  }
  0x79   :  { %1901 = vst [vmem:[#allocation79_spill] sm:$0xff] %v1532_v22  ;;  %1902 = vst [vmem:[#allocation80_spill] sm:$0xff] %v1534_v45  ;;  %s1079_s25 = sshll.u32 %s1150_s1, 4  ;;  %s1080_s25 = int_to_ptr.vmem [resolvable:$true] %s1079_s25 }
  0x7a   :  { %1903 = vst [vmem:[#allocation81_spill] sm:$0xff] %v1536_v9  ;;  %1904 = vst [vmem:[#allocation82_spill] sm:$0xff] %v1538_v48  ;;  %s1120_s26 = scalar_lea.vmem %s1080_s25, 14592  ;;  %p1125_p9 = scmp.lt.s32.totalorder %s1080_s25, %s1080_s25 }
  0x7b   :  { %1905 = vst [vmem:[#allocation83_spill] sm:$0xff] %v1546_v28  ;;  %1906 = vst [vmem:[#allocation84_spill] sm:$0xff] %v1548_v34  ;;  %p1121_p8 = scmp.ne.s32.totalorder %s1080_s25, %s1120_s26  ;;  %p1126_p10 = scmp.lt.s32.totalorder %s1120_s26, %s1120_s26 }
  0x7d   :  { %p1127_p11 = por %p1126_p10, %p1125_p9 }
  0x7f   :  { %p1128_p12 = pnand %p1127_p11, %p1121_p8 }
  0x94   :  { %v195_v20 = vpop.permute.xlu1 %194  ;;  %v185_v56 = vpop.permute.xlu0 %184 }
  0x95   :  { %v394_v51 = vadd.f32 %v1506_v38, %v195_v20  ;;  %v395_v21 = vadd.f32 %v1510_v49, %v195_v20  ;;  %v396_v47 = vadd.f32 %v1514_v41, %v195_v20  ;;  %v388_v8 = vadd.f32 %v1506_v38, %v185_v56 }
  0x96   :  { %v389_v40 = vadd.f32 %v1510_v49, %v185_v56  ;;  %v390_v26 = vadd.f32 %v1514_v41, %v185_v56 }
  0x97   :  { %v508_v46 = vmul.f32 0.2, %v394_v51  ;;  %v509_v9 = vmul.f32 0.2, %v395_v21  ;;  %v510_v32 = vmul.f32 0.2, %v396_v47 }
  0x98   :  { %v502_v48 = vmul.f32 0.2, %v388_v8  ;;  %v503_v45 = vmul.f32 0.2, %v389_v40  ;;  %v504_v22 = vmul.f32 0.2, %v390_v26  ;;  %v200_v16 = vpop.permute.xlu1 %199  ;;  %v190_v61 = vpop.permute.xlu0 %189 }
  0x99   :  { %v622_v39 = vmax.f32 %v394_v51, %v508_v46  ;;  %v623_v27 = vmax.f32 %v395_v21, %v509_v9  ;;  %v624_v20 = vmax.f32 %v396_v47, %v510_v32  ;;  %v397_v60 = vadd.f32 %v1506_v38, %v200_v16 }
  0x9a   :  { %v616_v15 = vmax.f32 %v388_v8, %v502_v48  ;;  %v617_v14 = vmax.f32 %v389_v40, %v503_v45  ;;  %v618_v56 = vmax.f32 %v390_v26, %v504_v22  ;;  %v398_v4 = vadd.f32 %v1510_v49, %v200_v16 }
  0x9b   :  { %v850_v33 = vmul.f32 %v1305_v52, %v622_v39  ;;  %v851_v34 = vmul.f32 %v1307_v53, %v623_v27  ;;  %v852_v28 = vmul.f32 %v1309_v57, %v624_v20  ;;  %v399_v10 = vadd.f32 %v1514_v41, %v200_v16 }
  0x9c   :  { %v844_v51 = vmul.f32 %v1311_v58, %v616_v15  ;;  %v845_v9 = vmul.f32 %v1313_v59, %v617_v14  ;;  %v846_v21 = vmul.f32 %v1315_v63, %v618_v56  ;;  %v511_v47 = vmul.f32 0.2, %v397_v60  ;;  %v210_v48 = vpop.permute.xlu1 %209  ;;  %v205_v16 = vpop.permute.xlu0 %204 }
  0x9d   :  { %965 = vst [vmem:[#allocation5 + $0x30] sm:$0xff] %v850_v33  ;;  %966 = vst [vmem:[#allocation5 + $0x38] sm:$0xff] %v851_v34  ;;  %v512_v22 = vmul.f32 0.2, %v398_v4  ;;  %v513_v52 = vmul.f32 0.2, %v399_v10  ;;  %v391_v53 = vadd.f32 %v1506_v38, %v190_v61  ;;  %v392_v57 = vadd.f32 %v1510_v49, %v190_v61 }
  0x9e   :  { %967 = vst.msk [vmem:[#allocation5 + $0x40] sm:$0xff] %vm960_vm0, %v852_v28  ;;  %958 = vst [vmem:[#allocation5] sm:$0xff] %v844_v51  ;;  %v625_v58 = vmax.f32 %v397_v60, %v511_v47  ;;  %v393_v59 = vadd.f32 %v1514_v41, %v190_v61  ;;  %v403_v63 = vadd.f32 %v1506_v38, %v210_v48 }
  0x9f   :  { %959 = vst [vmem:[#allocation5 + $0x8] sm:$0xff] %v845_v9  ;;  %961 = vst.msk [vmem:[#allocation5 + $0x10] sm:$0xff] %vm960_vm0, %v846_v21  ;;  %v404_v14 = vadd.f32 %v1510_v49, %v210_v48  ;;  %v626_v15 = vmax.f32 %v398_v4, %v512_v22  ;;  %v627_v26 = vmax.f32 %v399_v10, %v513_v52  ;;  %v505_v39 = vmul.f32 0.2, %v391_v53 }
  0xa0   :  { %v506_v27 = vmul.f32 0.2, %v392_v57  ;;  %v853_v40 = vmul.f32 %v1317_v0, %v625_v58  ;;  %v507_v45 = vmul.f32 0.2, %v393_v59  ;;  %v405_v8 = vadd.f32 %v1514_v41, %v210_v48  ;;  %v220_v32 = vpop.permute.xlu1 %219 }
  0xa1   :  { %v517_v28 = vmul.f32 0.2, %v403_v63  ;;  %v854_v34 = vmul.f32 %v1319_v1, %v626_v15  ;;  %v855_v60 = vmul.f32 %v1321_v5, %v627_v26  ;;  %v619_v61 = vmax.f32 %v391_v53, %v505_v39  ;;  %v215_v53 = vpop.permute.xlu0 %214 }
  0xa2   :  { %v620_v46 = vmax.f32 %v392_v57, %v506_v27  ;;  %968 = vst [vmem:[#allocation5 + $0x48] sm:$0xff] %v853_v40  ;;  %v621_v20 = vmax.f32 %v393_v59, %v507_v45  ;;  %v518_v56 = vmul.f32 0.2, %v404_v14  ;;  %v519_v10 = vmul.f32 0.2, %v405_v8 }
  0xa3   :  { %v631_v4 = vmax.f32 %v403_v63, %v517_v28  ;;  %969 = vst [vmem:[#allocation5 + $0x50] sm:$0xff] %v854_v34  ;;  %970 = vst.msk [vmem:[#allocation5 + $0x58] sm:$0xff] %vm960_vm0, %v855_v60  ;;  %v847_v0 = vmul.f32 %v1323_v6, %v619_v61  ;;  %v400_v51 = vadd.f32 %v1506_v38, %v205_v16 }
  0xa4   :  { %v848_v33 = vmul.f32 %v1325_v7, %v620_v46  ;;  %v401_v1 = vadd.f32 %v1510_v49, %v205_v16  ;;  %v849_v5 = vmul.f32 %v1327_v11, %v621_v20  ;;  %v632_v9 = vmax.f32 %v404_v14, %v518_v56  ;;  %v230_v15 = vpop.permute.xlu1 %229 }
  0xa5   :  { %v633_v21 = vmax.f32 %v405_v8, %v519_v10  ;;  %v859_v47 = vmul.f32 %v1329_v12, %v631_v4  ;;  %962 = vst [vmem:[#allocation5 + $0x18] sm:$0xff] %v847_v0  ;;  %v402_v48 = vadd.f32 %v1514_v41, %v205_v16  ;;  %v514_v22 = vmul.f32 0.2, %v400_v51  ;;  %v225_v56 = vpop.permute.xlu0 %224 }
  0xa6   :  { %963 = vst [vmem:[#allocation5 + $0x20] sm:$0xff] %v848_v33  ;;  %v515_v52 = vmul.f32 0.2, %v401_v1  ;;  %v409_v6 = vadd.f32 %v1506_v38, %v220_v32  ;;  %964 = vst.msk [vmem:[#allocation5 + $0x28] sm:$0xff] %vm960_vm0, %v849_v5  ;;  %v860_v7 = vmul.f32 %v1331_v13, %v632_v9  ;;  %v410_v11 = vadd.f32 %v1510_v49, %v220_v32 }
  0xa7   :  { %v861_v57 = vmul.f32 %v1333_v17, %v633_v21  ;;  %974 = vst [vmem:[#allocation5 + $0x78] sm:$0xff] %v859_v47  ;;  %v411_v12 = vadd.f32 %v1514_v41, %v220_v32  ;;  %v516_v58 = vmul.f32 0.2, %v402_v48  ;;  %v628_v59 = vmax.f32 %v400_v51, %v514_v22 }
  0xa8   :  { %v629_v63 = vmax.f32 %v401_v1, %v515_v52  ;;  %v523_v14 = vmul.f32 0.2, %v409_v6  ;;  %975 = vst [vmem:[#allocation5 + $0x80] sm:$0xff] %v860_v7  ;;  %v524_v26 = vmul.f32 0.2, %v410_v11  ;;  %v406_v27 = vadd.f32 %v1506_v38, %v215_v53 }
  0xa9   :  { %976 = vst.msk [vmem:[#allocation5 + $0x88] sm:$0xff] %vm960_vm0, %v861_v57  ;;  %v525_v39 = vmul.f32 0.2, %v411_v12  ;;  %v407_v13 = vadd.f32 %v1510_v49, %v215_v53  ;;  %v630_v17 = vmax.f32 %v402_v48, %v516_v58  ;;  %v856_v16 = vmul.f32 %v1335_v18, %v628_v59 }
  0xaa   :  { %v857_v40 = vmul.f32 %v1337_v19, %v629_v63  ;;  %v637_v45 = vmax.f32 %v409_v6, %v523_v14  ;;  %v638_v8 = vmax.f32 %v410_v11, %v524_v26  ;;  %v408_v34 = vadd.f32 %v1514_v41, %v215_v53 }
  0xab   :  { %v639_v28 = vmax.f32 %v411_v12, %v525_v39  ;;  %v520_v60 = vmul.f32 0.2, %v406_v27  ;;  %v858_v61 = vmul.f32 %v1339_v23, %v630_v17  ;;  %971 = vst [vmem:[#allocation5 + $0x60] sm:$0xff] %v856_v16  ;;  %v521_v32 = vmul.f32 0.2, %v407_v13  ;;  %v235_v12 = vpop.permute.xlu0 %234 }
  0xac   :  { %972 = vst [vmem:[#allocation5 + $0x68] sm:$0xff] %v857_v40  ;;  %v865_v46 = vmul.f32 %v1341_v24, %v637_v45  ;;  %v415_v20 = vadd.f32 %v1506_v38, %v230_v15  ;;  %v866_v18 = vmul.f32 %v1343_v25, %v638_v8  ;;  %v522_v10 = vmul.f32 0.2, %v408_v34  ;;  %v240_v24 = vpop.permute.xlu1 %239 }
  0xad   :  { %v867_v19 = vmul.f32 %v1345_v29, %v639_v28  ;;  %v634_v4 = vmax.f32 %v406_v27, %v520_v60  ;;  %973 = vst.msk [vmem:[#allocation5 + $0x70] sm:$0xff] %vm960_vm0, %v858_v61  ;;  %v635_v0 = vmax.f32 %v407_v13, %v521_v32  ;;  %v416_v23 = vadd.f32 %v1510_v49, %v230_v15 }
  0xae   :  { %980 = vst [vmem:[#allocation5 + $0xa8] sm:$0xff] %v865_v46  ;;  %v417_v33 = vadd.f32 %v1514_v41, %v230_v15  ;;  %v529_v51 = vmul.f32 0.2, %v415_v20  ;;  %981 = vst [vmem:[#allocation5 + $0xb0] sm:$0xff] %v866_v18  ;;  %v636_v1 = vmax.f32 %v408_v34, %v522_v10  ;;  %v412_v29 = vadd.f32 %v1506_v38, %v225_v56 }
  0xaf   :  { %982 = vst.msk [vmem:[#allocation5 + $0xb8] sm:$0xff] %vm960_vm0, %v867_v19  ;;  %v862_v25 = vmul.f32 %v1347_v30, %v634_v4  ;;  %v413_v5 = vadd.f32 %v1510_v49, %v225_v56  ;;  %v863_v9 = vmul.f32 %v1349_v31, %v635_v0  ;;  %v530_v21 = vmul.f32 0.2, %v416_v23  ;;  %v245_v46 = vpop.permute.xlu0 %244 }
  0xb0   :  { %v531_v47 = vmul.f32 0.2, %v417_v33  ;;  %v643_v48 = vmax.f32 %v415_v20, %v529_v51  ;;  %v864_v22 = vmul.f32 %v1351_v35, %v636_v1  ;;  %v414_v52 = vadd.f32 %v1514_v41, %v225_v56  ;;  %v250_v39 = vpop.permute.xlu1 %249 }
  0xb1   :  { %977 = vst [vmem:[#allocation5 + $0x90] sm:$0xff] %v862_v25  ;;  %v526_v6 = vmul.f32 0.2, %v412_v29  ;;  %v527_v53 = vmul.f32 0.2, %v413_v5  ;;  %978 = vst [vmem:[#allocation5 + $0x98] sm:$0xff] %v863_v9  ;;  %v644_v7 = vmax.f32 %v416_v23, %v530_v21  ;;  %v421_v11 = vadd.f32 %v1506_v38, %v240_v24 }
  0xb2   :  { %v645_v57 = vmax.f32 %v417_v33, %v531_v47  ;;  %v871_v30 = vmul.f32 %v1353_v36, %v643_v48  ;;  %979 = vst.msk [vmem:[#allocation5 + $0xa0] sm:$0xff] %vm960_vm0, %v864_v22  ;;  %v528_v31 = vmul.f32 0.2, %v414_v52  ;;  %v422_v35 = vadd.f32 %v1510_v49, %v240_v24  ;;  %v1907_v25 = vld [vmem:[#allocation8_spill] sm:$0xff]  ;;  %v1908_v47 = vld [vmem:[#allocation9_spill] sm:$0xff] }
  0xb3   :  { %v640_v58 = vmax.f32 %v412_v29, %v526_v6  ;;  %v641_v59 = vmax.f32 %v413_v5, %v527_v53  ;;  %v872_v63 = vmul.f32 %v1355_v37, %v644_v7  ;;  %v423_v15 = vadd.f32 %v1514_v41, %v240_v24  ;;  %v1910_v7 = vld [vmem:[#allocation11_spill] sm:$0xff] }
  0xb4   :  { %v873_v14 = vmul.f32 %v1357_v42, %v645_v57  ;;  %986 = vst [vmem:[#allocation5 + $0xd8] sm:$0xff] %v871_v30  ;;  %v535_v26 = vmul.f32 0.2, %v421_v11  ;;  %v642_v36 = vmax.f32 %v414_v52, %v528_v31  ;;  %v536_v17 = vmul.f32 0.2, %v422_v35  ;;  %v260_v51 = vpop.permute.xlu1 %259 }
  0xb5   :  { %v868_v27 = vmul.f32 %v1359_v43, %v640_v58  ;;  %v869_v13 = vmul.f32 %v1361_v44, %v641_v59  ;;  %987 = vst [vmem:[#allocation5 + $0xe0] sm:$0xff] %v872_v63  ;;  %v537_v16 = vmul.f32 0.2, %v423_v15  ;;  %v418_v37 = vadd.f32 %v1506_v38, %v235_v12 }
  0xb6   :  { %988 = vst.msk [vmem:[#allocation5 + $0xe8] sm:$0xff] %vm960_vm0, %v873_v14  ;;  %v649_v40 = vmax.f32 %v421_v11, %v535_v26  ;;  %v419_v42 = vadd.f32 %v1510_v49, %v235_v12  ;;  %v870_v45 = vmul.f32 %v1363_v50, %v642_v36  ;;  %v650_v8 = vmax.f32 %v422_v35, %v536_v17 }
  0xb7   :  { %983 = vst [vmem:[#allocation5 + $0xc0] sm:$0xff] %v868_v27  ;;  %984 = vst [vmem:[#allocation5 + $0xc8] sm:$0xff] %v869_v13  ;;  %v420_v28 = vadd.f32 %v1514_v41, %v235_v12  ;;  %v427_v43 = vadd.f32 %v1506_v38, %v250_v39  ;;  %v651_v44 = vmax.f32 %v423_v15, %v537_v16  ;;  %v532_v60 = vmul.f32 0.2, %v418_v37  ;;  %v1912_v27 = vld [vmem:[#allocation13_spill] sm:$0xff] }
  0xb8   :  { %v877_v34 = vmul.f32 %v1365_v54, %v649_v40  ;;  %v533_v61 = vmul.f32 0.2, %v419_v42  ;;  %985 = vst.msk [vmem:[#allocation5 + $0xd0] sm:$0xff] %vm960_vm0, %v870_v45  ;;  %v878_v32 = vmul.f32 %v1367_v55, %v650_v8  ;;  %v428_v50 = vadd.f32 %v1510_v49, %v250_v39  ;;  %v270_v26 = vpop.permute.xlu1 %269  ;;  %v1913_v40 = vld [vmem:[#allocation14_spill] sm:$0xff] }
  0xb9   :  { %v534_v20 = vmul.f32 0.2, %v420_v28  ;;  %v429_v56 = vadd.f32 %v1514_v41, %v250_v39  ;;  %v879_v18 = vmul.f32 %v1369_v62, %v651_v44  ;;  %v646_v19 = vmax.f32 %v418_v37, %v532_v60  ;;  %v1911_v39 = vld [vmem:[#allocation12_spill] sm:$0xff] }
  0xba   :  { %992 = vst [vmem:[#allocation5 + $0x108] sm:$0xff] %v877_v34  ;;  %v647_v10 = vmax.f32 %v419_v42, %v533_v61  ;;  %v541_v4 = vmul.f32 0.2, %v427_v43  ;;  %993 = vst [vmem:[#allocation5 + $0x110] sm:$0xff] %v878_v32  ;;  %v542_v0 = vmul.f32 0.2, %v428_v50  ;;  %v424_v33 = vadd.f32 %v1506_v38, %v245_v46 }
  0xbb   :  { %v648_v54 = vmax.f32 %v420_v28, %v534_v20  ;;  %v543_v23 = vmul.f32 0.2, %v429_v56  ;;  %994 = vst.msk [vmem:[#allocation5 + $0x118] sm:$0xff] %vm960_vm0, %v879_v18  ;;  %v874_v55 = vmul.f32 %v1371_v2, %v646_v19  ;;  %v425_v62 = vadd.f32 %v1510_v49, %v245_v46  ;;  %v255_v2 = vpop.permute.xlu0 %254  ;;  %v1916_v18 = vld [vmem:[#allocation17_spill] sm:$0xff] }
  0xbc   :  { %v875_v24 = vmul.f32 %v1373_v3, %v647_v10  ;;  %v655_v1 = vmax.f32 %v427_v43, %v541_v4  ;;  %v656_v5 = vmax.f32 %v428_v50, %v542_v0  ;;  %v426_v21 = vadd.f32 %v1514_v41, %v245_v46  ;;  %v1909_v3 = vld [vmem:[#allocation10_spill] sm:$0xff]  ;;  %v1914_v43 = vld [vmem:[#allocation15_spill] sm:$0xff]  ;;  %v1915_v46 = vld [vmem:[#allocation16_spill] sm:$0xff] }
  0xbd   :  { %v876_v29 = vmul.f32 %v1907_v25, %v648_v54  ;;  %v657_v9 = vmax.f32 %v429_v56, %v543_v23  ;;  %989 = vst [vmem:[#allocation5 + $0xf0] sm:$0xff] %v874_v55  ;;  %v538_v22 = vmul.f32 0.2, %v424_v33  ;;  %v539_v52 = vmul.f32 0.2, %v425_v62  ;;  %v1917_v23 = vld [vmem:[#allocation18_spill] sm:$0xff] }
  0xbe   :  { %990 = vst [vmem:[#allocation5 + $0xf8] sm:$0xff] %v875_v24  ;;  %v883_v48 = vmul.f32 %v1908_v47, %v655_v1  ;;  %v433_v6 = vadd.f32 %v1506_v38, %v260_v51  ;;  %v884_v53 = vmul.f32 %v1909_v3, %v656_v5  ;;  %v540_v30 = vmul.f32 0.2, %v426_v21  ;;  %v280_v24 = vpop.permute.xlu1 %279  ;;  %v1918_v1 = vld [vmem:[#allocation19_spill] sm:$0xff] }
  0xbf   :  { %991 = vst.msk [vmem:[#allocation5 + $0x100] sm:$0xff] %vm960_vm0, %v876_v29  ;;  %v885_v57 = vmul.f32 %v1910_v7, %v657_v9  ;;  %v434_v11 = vadd.f32 %v1510_v49, %v260_v51  ;;  %v652_v12 = vmax.f32 %v424_v33, %v538_v22  ;;  %v653_v31 = vmax.f32 %v425_v62, %v539_v52  ;;  %v265_v61 = vpop.permute.xlu0 %264  ;;  %v1919_v9 = vld [vmem:[#allocation20_spill] sm:$0xff] }
  0xc0   :  { %998 = vst [vmem:[#allocation5 + $0x138] sm:$0xff] %v883_v48  ;;  %v435_v58 = vadd.f32 %v1514_v41, %v260_v51  ;;  %v547_v59 = vmul.f32 0.2, %v433_v6  ;;  %999 = vst [vmem:[#allocation5 + $0x140] sm:$0xff] %v884_v53  ;;  %v654_v35 = vmax.f32 %v426_v21, %v540_v30  ;;  %v430_v14 = vadd.f32 %v1506_v38, %v255_v2 }
  0xc1   :  { %1000 = vst.msk [vmem:[#allocation5 + $0x148] sm:$0xff] %vm960_vm0, %v885_v57  ;;  %v548_v63 = vmul.f32 0.2, %v434_v11  ;;  %v431_v15 = vadd.f32 %v1510_v49, %v255_v2  ;;  %v880_v36 = vmul.f32 %v1911_v39, %v652_v12  ;;  %v881_v13 = vmul.f32 %v1912_v27, %v653_v31  ;;  %v1921_v57 = vld [vmem:[#allocation22_spill] sm:$0xff] }
  0xc2   :  { %v549_v17 = vmul.f32 0.2, %v435_v58  ;;  %v661_v16 = vmax.f32 %v433_v6, %v547_v59  ;;  %v882_v37 = vmul.f32 %v1913_v40, %v654_v35  ;;  %v432_v45 = vadd.f32 %v1514_v41, %v255_v2  ;;  %v1920_v6 = vld [vmem:[#allocation21_spill] sm:$0xff] }
  0xc3   :  { %v662_v42 = vmax.f32 %v434_v11, %v548_v63  ;;  %v544_v8 = vmul.f32 0.2, %v430_v14  ;;  %995 = vst [vmem:[#allocation5 + $0x120] sm:$0xff] %v880_v36  ;;  %996 = vst [vmem:[#allocation5 + $0x128] sm:$0xff] %v881_v13  ;;  %v545_v34 = vmul.f32 0.2, %v431_v15  ;;  %v439_v60 = vadd.f32 %v1506_v38, %v270_v26  ;;  %v275_v7 = vpop.permute.xlu0 %274  ;;  %v290_v13 = vpop.permute.xlu1 %289 }
  0xc4   :  { %v663_v28 = vmax.f32 %v435_v58, %v549_v17  ;;  %v889_v44 = vmul.f32 %v1914_v43, %v661_v16  ;;  %997 = vst.msk [vmem:[#allocation5 + $0x130] sm:$0xff] %vm960_vm0, %v882_v37  ;;  %v546_v20 = vmul.f32 0.2, %v432_v45  ;;  %v440_v56 = vadd.f32 %v1510_v49, %v270_v26  ;;  %v1922_v58 = vld [vmem:[#allocation23_spill] sm:$0xff]  ;;  %v1924_v17 = vld [vmem:[#allocation25_spill] sm:$0xff] }
  0xc5   :  { %v890_v32 = vmul.f32 %v1915_v46, %v662_v42  ;;  %v658_v50 = vmax.f32 %v430_v14, %v544_v8  ;;  %v659_v10 = vmax.f32 %v431_v15, %v545_v34  ;;  %v441_v4 = vadd.f32 %v1514_v41, %v270_v26  ;;  %v1923_v26 = vld [vmem:[#allocation24_spill] sm:$0xff] }
  0xc6   :  { %v891_v19 = vmul.f32 %v1916_v18, %v663_v28  ;;  %1004 = vst [vmem:[#allocation5 + $0x168] sm:$0xff] %v889_v44  ;;  %v553_v54 = vmul.f32 0.2, %v439_v60  ;;  %v660_v0 = vmax.f32 %v432_v45, %v546_v20  ;;  %v554_v51 = vmul.f32 0.2, %v440_v56  ;;  %v1925_v45 = vld [vmem:[#allocation26_spill] sm:$0xff] }
  0xc7   :  { %1005 = vst [vmem:[#allocation5 + $0x170] sm:$0xff] %v890_v32  ;;  %v886_v33 = vmul.f32 %v1917_v23, %v658_v50  ;;  %v436_v55 = vadd.f32 %v1506_v38, %v265_v61  ;;  %v887_v62 = vmul.f32 %v1918_v1, %v659_v10  ;;  %v555_v25 = vmul.f32 0.2, %v441_v4  ;;  %v285_v20 = vpop.permute.xlu0 %284  ;;  %v1927_v50 = vld [vmem:[#allocation28_spill] sm:$0xff] }
  0xc8   :  { %1006 = vst.msk [vmem:[#allocation5 + $0x178] sm:$0xff] %vm960_vm0, %v891_v19  ;;  %v667_v29 = vmax.f32 %v439_v60, %v553_v54  ;;  %v437_v5 = vadd.f32 %v1510_v49, %v265_v61  ;;  %v888_v21 = vmul.f32 %v1919_v9, %v660_v0  ;;  %v668_v47 = vmax.f32 %v440_v56, %v554_v51  ;;  %v1926_v60 = vld [vmem:[#allocation27_spill] sm:$0xff] }
  0xc9   :  { %1001 = vst [vmem:[#allocation5 + $0x150] sm:$0xff] %v886_v33  ;;  %v438_v48 = vadd.f32 %v1514_v41, %v265_v61  ;;  %v550_v22 = vmul.f32 0.2, %v436_v55  ;;  %1002 = vst [vmem:[#allocation5 + $0x158] sm:$0xff] %v887_v62  ;;  %v669_v52 = vmax.f32 %v441_v4, %v555_v25  ;;  %v445_v53 = vadd.f32 %v1506_v38, %v280_v24  ;;  %v1928_v4 = vld [vmem:[#allocation29_spill] sm:$0xff]  ;;  %v300_v25 = vpop.permute.xlu1 %299 }
  0xca   :  { %v895_v2 = vmul.f32 %v1920_v6, %v667_v29  ;;  %v551_v3 = vmul.f32 0.2, %v437_v5  ;;  %1003 = vst.msk [vmem:[#allocation5 + $0x160] sm:$0xff] %vm960_vm0, %v888_v21  ;;  %v896_v30 = vmul.f32 %v1921_v57, %v668_v47  ;;  %v446_v31 = vadd.f32 %v1510_v49, %v280_v24  ;;  %v1930_v29 = vld [vmem:[#allocation31_spill] sm:$0xff] }
  0xcb   :  { %v552_v11 = vmul.f32 0.2, %v438_v48  ;;  %v664_v12 = vmax.f32 %v436_v55, %v550_v22  ;;  %v897_v59 = vmul.f32 %v1922_v58, %v669_v52  ;;  %v447_v63 = vadd.f32 %v1514_v41, %v280_v24  ;;  %v1929_v55 = vld [vmem:[#allocation30_spill] sm:$0xff] }
  0xcc   :  { %1010 = vst [vmem:[#allocation5 + $0x198] sm:$0xff] %v895_v2  ;;  %v665_v35 = vmax.f32 %v437_v5, %v551_v3  ;;  %v559_v14 = vmul.f32 0.2, %v445_v53  ;;  %1011 = vst [vmem:[#allocation5 + $0x1a0] sm:$0xff] %v896_v30  ;;  %v560_v36 = vmul.f32 0.2, %v446_v31  ;;  %v442_v27 = vadd.f32 %v1506_v38, %v275_v7 }
  0xcd   :  { %v666_v15 = vmax.f32 %v438_v48, %v552_v11  ;;  %v892_v39 = vmul.f32 %v1923_v26, %v664_v12  ;;  %1012 = vst.msk [vmem:[#allocation5 + $0x1a8] sm:$0xff] %vm960_vm0, %v897_v59  ;;  %v561_v40 = vmul.f32 0.2, %v447_v63  ;;  %v443_v42 = vadd.f32 %v1510_v49, %v275_v7  ;;  %v1931_v48 = vld [vmem:[#allocation32_spill] sm:$0xff]  ;;  %v295_v11 = vpop.permute.xlu0 %294  ;;  %v1933_v12 = vld [vmem:[#allocation34_spill] sm:$0xff] }
  0xce   :  { %v893_v16 = vmul.f32 %v1924_v17, %v665_v35  ;;  %v673_v37 = vmax.f32 %v445_v53, %v559_v14  ;;  %v674_v28 = vmax.f32 %v446_v31, %v560_v36  ;;  %v444_v43 = vadd.f32 %v1514_v41, %v275_v7  ;;  %v1932_v53 = vld [vmem:[#allocation33_spill] sm:$0xff] }
  0xcf   :  { %v894_v8 = vmul.f32 %v1925_v45, %v666_v15  ;;  %1007 = vst [vmem:[#allocation5 + $0x180] sm:$0xff] %v892_v39  ;;  %v556_v44 = vmul.f32 0.2, %v442_v27  ;;  %v675_v34 = vmax.f32 %v447_v63, %v561_v40  ;;  %v557_v46 = vmul.f32 0.2, %v443_v42  ;;  %v1934_v63 = vld [vmem:[#allocation35_spill] sm:$0xff]  ;;  %v310_v40 = vpop.permute.xlu1 %309 }
  0xd0   :  { %1008 = vst [vmem:[#allocation5 + $0x188] sm:$0xff] %v893_v16  ;;  %v901_v61 = vmul.f32 %v1926_v60, %v673_v37  ;;  %v451_v32 = vadd.f32 %v1506_v38, %v290_v13  ;;  %v902_v56 = vmul.f32 %v1927_v50, %v674_v28  ;;  %v558_v18 = vmul.f32 0.2, %v444_v43  ;;  %v1936_v37 = vld [vmem:[#allocation37_spill] sm:$0xff] }
  0xd1   :  { %1009 = vst.msk [vmem:[#allocation5 + $0x190] sm:$0xff] %vm960_vm0, %v894_v8  ;;  %v670_v19 = vmax.f32 %v442_v27, %v556_v44  ;;  %v452_v10 = vadd.f32 %v1510_v49, %v290_v13  ;;  %v903_v54 = vmul.f32 %v1928_v4, %v675_v34  ;;  %v671_v0 = vmax.f32 %v443_v42, %v557_v46  ;;  %v1935_v27 = vld [vmem:[#allocation36_spill] sm:$0xff] }
  0xd2   :  { %1016 = vst [vmem:[#allocation5 + $0x1c8] sm:$0xff] %v901_v61  ;;  %v453_v23 = vadd.f32 %v1514_v41, %v290_v13  ;;  %v565_v33 = vmul.f32 0.2, %v451_v32  ;;  %1017 = vst [vmem:[#allocation5 + $0x1d0] sm:$0xff] %v902_v56  ;;  %v672_v51 = vmax.f32 %v444_v43, %v558_v18  ;;  %v448_v62 = vadd.f32 %v1506_v38, %v285_v20  ;;  %v1937_v43 = vld [vmem:[#allocation38_spill] sm:$0xff]  ;;  %v305_v18 = vpop.permute.xlu0 %304 }
  0xd3   :  { %v898_v24 = vmul.f32 %v1929_v55, %v670_v19  ;;  %v566_v1 = vmul.f32 0.2, %v452_v10  ;;  %1018 = vst.msk [vmem:[#allocation5 + $0x1d8] sm:$0xff] %vm960_vm0, %v903_v54  ;;  %v899_v5 = vmul.f32 %v1930_v29, %v671_v0  ;;  %v449_v47 = vadd.f32 %v1510_v49, %v285_v20  ;;  %v1939_v19 = vld [vmem:[#allocation40_spill] sm:$0xff] }
  0xd4   :  { %v567_v9 = vmul.f32 0.2, %v453_v23  ;;  %v679_v21 = vmax.f32 %v451_v32, %v565_v33  ;;  %v900_v22 = vmul.f32 %v1931_v48, %v672_v51  ;;  %v450_v6 = vadd.f32 %v1514_v41, %v285_v20  ;;  %v1938_v32 = vld [vmem:[#allocation39_spill] sm:$0xff] }
  0xd5   :  { %1013 = vst [vmem:[#allocation5 + $0x1b0] sm:$0xff] %v898_v24  ;;  %v680_v52 = vmax.f32 %v452_v10, %v566_v1  ;;  %v562_v2 = vmul.f32 0.2, %v448_v62  ;;  %1014 = vst [vmem:[#allocation5 + $0x1b8] sm:$0xff] %v899_v5  ;;  %v563_v57 = vmul.f32 0.2, %v449_v47  ;;  %v457_v30 = vadd.f32 %v1506_v38, %v300_v25 }
  0xd6   :  { %v681_v3 = vmax.f32 %v453_v23, %v567_v9  ;;  %v907_v7 = vmul.f32 %v1932_v53, %v679_v21  ;;  %1015 = vst.msk [vmem:[#allocation5 + $0x1c0] sm:$0xff] %vm960_vm0, %v900_v22  ;;  %v564_v58 = vmul.f32 0.2, %v450_v6  ;;  %v458_v35 = vadd.f32 %v1510_v49, %v300_v25  ;;  %v1940_v23 = vld [vmem:[#allocation41_spill] sm:$0xff]  ;;  %v320_v9 = vpop.permute.xlu1 %319  ;;  %v1942_v21 = vld [vmem:[#allocation43_spill] sm:$0xff] }
  0xd7   :  { %v908_v31 = vmul.f32 %v1933_v12, %v680_v52  ;;  %v676_v59 = vmax.f32 %v448_v62, %v562_v2  ;;  %v677_v15 = vmax.f32 %v449_v47, %v563_v57  ;;  %v459_v26 = vadd.f32 %v1514_v41, %v300_v25  ;;  %v1941_v62 = vld [vmem:[#allocation42_spill] sm:$0xff] }
  0xd8   :  { %v909_v14 = vmul.f32 %v1934_v63, %v681_v3  ;;  %1022 = vst [vmem:[#allocation5 + $0x1f8] sm:$0xff] %v907_v7  ;;  %v571_v39 = vmul.f32 0.2, %v457_v30  ;;  %v678_v36 = vmax.f32 %v450_v6, %v564_v58  ;;  %v572_v17 = vmul.f32 0.2, %v458_v35  ;;  %v1943_v6 = vld [vmem:[#allocation44_spill] sm:$0xff]  ;;  %v315_v58 = vpop.permute.xlu0 %314 }
  0xd9   :  { %1023 = vst [vmem:[#allocation5 + $0x200] sm:$0xff] %v908_v31  ;;  %v904_v13 = vmul.f32 %v1935_v27, %v676_v59  ;;  %v454_v16 = vadd.f32 %v1506_v38, %v295_v11  ;;  %v905_v42 = vmul.f32 %v1936_v37, %v677_v15  ;;  %v573_v45 = vmul.f32 0.2, %v459_v26  ;;  %v1945_v59 = vld [vmem:[#allocation46_spill] sm:$0xff] }
  0xda   :  { %1024 = vst.msk [vmem:[#allocation5 + $0x208] sm:$0xff] %vm960_vm0, %v909_v14  ;;  %v685_v8 = vmax.f32 %v457_v30, %v571_v39  ;;  %v455_v28 = vadd.f32 %v1510_v49, %v295_v11  ;;  %v906_v44 = vmul.f32 %v1937_v43, %v678_v36  ;;  %v686_v34 = vmax.f32 %v458_v35, %v572_v17  ;;  %v1944_v30 = vld [vmem:[#allocation45_spill] sm:$0xff] }
  0xdb   :  { %1019 = vst [vmem:[#allocation5 + $0x1e0] sm:$0xff] %v904_v13  ;;  %v456_v60 = vadd.f32 %v1514_v41, %v295_v11  ;;  %v568_v61 = vmul.f32 0.2, %v454_v16  ;;  %1020 = vst [vmem:[#allocation5 + $0x1e8] sm:$0xff] %v905_v42  ;;  %v687_v46 = vmax.f32 %v459_v26, %v573_v45  ;;  %v463_v56 = vadd.f32 %v1506_v38, %v310_v40  ;;  %v1946_v26 = vld [vmem:[#allocation47_spill] sm:$0xff]  ;;  %v330_v45 = vpop.permute.xlu1 %329 }
  0xdc   :  { %v913_v20 = vmul.f32 %v1938_v32, %v685_v8  ;;  %v569_v50 = vmul.f32 0.2, %v455_v28  ;;  %1021 = vst.msk [vmem:[#allocation5 + $0x1f0] sm:$0xff] %vm960_vm0, %v906_v44  ;;  %v914_v10 = vmul.f32 %v1939_v19, %v686_v34  ;;  %v464_v0 = vadd.f32 %v1510_v49, %v310_v40  ;;  %v1948_v8 = vld [vmem:[#allocation49_spill] sm:$0xff] }
  0xdd   :  { %v570_v4 = vmul.f32 0.2, %v456_v60  ;;  %v682_v54 = vmax.f32 %v454_v16, %v568_v61  ;;  %v915_v33 = vmul.f32 %v1940_v23, %v687_v46  ;;  %v465_v55 = vadd.f32 %v1514_v41, %v310_v40  ;;  %v1947_v16 = vld [vmem:[#allocation48_spill] sm:$0xff] }
  0xde   :  { %1028 = vst [vmem:[#allocation5 + $0x228] sm:$0xff] %v913_v20  ;;  %v683_v51 = vmax.f32 %v455_v28, %v569_v50  ;;  %v577_v24 = vmul.f32 0.2, %v463_v56  ;;  %1029 = vst [vmem:[#allocation5 + $0x230] sm:$0xff] %v914_v10  ;;  %v578_v29 = vmul.f32 0.2, %v464_v0  ;;  %v460_v5 = vadd.f32 %v1506_v38, %v305_v18 }
  0xdf   :  { %v684_v1 = vmax.f32 %v456_v60, %v570_v4  ;;  %v910_v25 = vmul.f32 %v1941_v62, %v682_v54  ;;  %1030 = vst.msk [vmem:[#allocation5 + $0x238] sm:$0xff] %vm960_vm0, %v915_v33  ;;  %v579_v48 = vmul.f32 0.2, %v465_v55  ;;  %v461_v52 = vadd.f32 %v1510_v49, %v305_v18  ;;  %v1949_v60 = vld [vmem:[#allocation50_spill] sm:$0xff]  ;;  %v325_v4 = vpop.permute.xlu0 %324  ;;  %v1951_v54 = vld [vmem:[#allocation52_spill] sm:$0xff] }
  0xe0   :  { %v911_v47 = vmul.f32 %v1942_v21, %v683_v51  ;;  %v691_v22 = vmax.f32 %v463_v56, %v577_v24  ;;  %v692_v3 = vmax.f32 %v464_v0, %v578_v29  ;;  %v462_v53 = vadd.f32 %v1514_v41, %v305_v18  ;;  %v1950_v56 = vld [vmem:[#allocation51_spill] sm:$0xff] }
  0xe1   :  { %v912_v2 = vmul.f32 %v1943_v6, %v684_v1  ;;  %1025 = vst [vmem:[#allocation5 + $0x210] sm:$0xff] %v910_v25  ;;  %v574_v7 = vmul.f32 0.2, %v460_v5  ;;  %v693_v57 = vmax.f32 %v465_v55, %v579_v48  ;;  %v575_v12 = vmul.f32 0.2, %v461_v52  ;;  %v1952_v55 = vld [vmem:[#allocation53_spill] sm:$0xff]  ;;  %v340_v48 = vpop.permute.xlu1 %339 }
  0xe2   :  { %1026 = vst [vmem:[#allocation5 + $0x218] sm:$0xff] %v911_v47  ;;  %v919_v11 = vmul.f32 %v1944_v30, %v691_v22  ;;  %v469_v31 = vadd.f32 %v1506_v38, %v320_v9  ;;  %v920_v35 = vmul.f32 %v1945_v59, %v692_v3  ;;  %v576_v63 = vmul.f32 0.2, %v462_v53  ;;  %v1954_v22 = vld [vmem:[#allocation55_spill] sm:$0xff] }
  0xe3   :  { %1027 = vst.msk [vmem:[#allocation5 + $0x220] sm:$0xff] %vm960_vm0, %v912_v2  ;;  %v688_v14 = vmax.f32 %v460_v5, %v574_v7  ;;  %v470_v15 = vadd.f32 %v1510_v49, %v320_v9  ;;  %v921_v39 = vmul.f32 %v1946_v26, %v693_v57  ;;  %v689_v36 = vmax.f32 %v461_v52, %v575_v12  ;;  %v1953_v5 = vld [vmem:[#allocation54_spill] sm:$0xff] }
  0xe4   :  { %1034 = vst [vmem:[#allocation5 + $0x258] sm:$0xff] %v919_v11  ;;  %v471_v27 = vadd.f32 %v1514_v41, %v320_v9  ;;  %v583_v13 = vmul.f32 0.2, %v469_v31  ;;  %1035 = vst [vmem:[#allocation5 + $0x260] sm:$0xff] %v920_v35  ;;  %v690_v17 = vmax.f32 %v462_v53, %v576_v63  ;;  %v466_v42 = vadd.f32 %v1506_v38, %v315_v58  ;;  %v1955_v53 = vld [vmem:[#allocation56_spill] sm:$0xff]  ;;  %v335_v63 = vpop.permute.xlu0 %334 }
  0xe5   :  { %v916_v40 = vmul.f32 %v1947_v16, %v688_v14  ;;  %v584_v37 = vmul.f32 0.2, %v470_v15  ;;  %1036 = vst.msk [vmem:[#allocation5 + $0x268] sm:$0xff] %vm960_vm0, %v921_v39  ;;  %v917_v28 = vmul.f32 %v1948_v8, %v689_v36  ;;  %v467_v34 = vadd.f32 %v1510_v49, %v315_v58  ;;  %v1957_v14 = vld [vmem:[#allocation58_spill] sm:$0xff] }
  0xe6   :  { %v585_v43 = vmul.f32 0.2, %v471_v27  ;;  %v697_v44 = vmax.f32 %v469_v31, %v583_v13  ;;  %v918_v61 = vmul.f32 %v1949_v60, %v690_v17  ;;  %v468_v32 = vadd.f32 %v1514_v41, %v315_v58  ;;  %v1956_v31 = vld [vmem:[#allocation57_spill] sm:$0xff] }
  0xe7   :  { %1031 = vst [vmem:[#allocation5 + $0x240] sm:$0xff] %v916_v40  ;;  %v698_v46 = vmax.f32 %v470_v15, %v584_v37  ;;  %v580_v20 = vmul.f32 0.2, %v466_v42  ;;  %1032 = vst [vmem:[#allocation5 + $0x248] sm:$0xff] %v917_v28  ;;  %v581_v19 = vmul.f32 0.2, %v467_v34  ;;  %v475_v10 = vadd.f32 %v1506_v38, %v330_v45 }
  0xe8   :  { %v699_v50 = vmax.f32 %v471_v27, %v585_v43  ;;  %v925_v18 = vmul.f32 %v1950_v56, %v697_v44  ;;  %1033 = vst.msk [vmem:[#allocation5 + $0x250] sm:$0xff] %vm960_vm0, %v918_v61  ;;  %v582_v23 = vmul.f32 0.2, %v468_v32  ;;  %v476_v51 = vadd.f32 %v1510_v49, %v330_v45  ;;  %v1958_v27 = vld [vmem:[#allocation59_spill] sm:$0xff]  ;;  %v350_v43 = vpop.permute.xlu1 %349  ;;  %v1960_v44 = vld [vmem:[#allocation61_spill] sm:$0xff] }
  0xe9   :  { %v926_v0 = vmul.f32 %v1951_v54, %v698_v46  ;;  %v694_v33 = vmax.f32 %v466_v42, %v580_v20  ;;  %v695_v1 = vmax.f32 %v467_v34, %v581_v19  ;;  %v477_v62 = vadd.f32 %v1514_v41, %v330_v45  ;;  %v1959_v42 = vld [vmem:[#allocation60_spill] sm:$0xff] }
  0xea   :  { %v927_v24 = vmul.f32 %v1952_v55, %v699_v50  ;;  %1040 = vst [vmem:[#allocation5 + $0x288] sm:$0xff] %v925_v18  ;;  %v589_v25 = vmul.f32 0.2, %v475_v10  ;;  %v696_v29 = vmax.f32 %v468_v32, %v582_v23  ;;  %v590_v21 = vmul.f32 0.2, %v476_v51  ;;  %v1961_v32 = vld [vmem:[#allocation62_spill] sm:$0xff]  ;;  %v345_v23 = vpop.permute.xlu0 %344 }
  0xeb   :  { %1041 = vst [vmem:[#allocation5 + $0x290] sm:$0xff] %v926_v0  ;;  %v922_v9 = vmul.f32 %v1953_v5, %v694_v33  ;;  %v472_v47 = vadd.f32 %v1506_v38, %v325_v4  ;;  %v923_v52 = vmul.f32 %v1954_v22, %v695_v1  ;;  %v591_v6 = vmul.f32 0.2, %v477_v62  ;;  %v1963_v33 = vld [vmem:[#allocation64_spill] sm:$0xff] }
  0xec   :  { %1042 = vst.msk [vmem:[#allocation5 + $0x298] sm:$0xff] %vm960_vm0, %v927_v24  ;;  %v703_v2 = vmax.f32 %v475_v10, %v589_v25  ;;  %v473_v3 = vadd.f32 %v1510_v49, %v325_v4  ;;  %v924_v7 = vmul.f32 %v1955_v53, %v696_v29  ;;  %v704_v57 = vmax.f32 %v476_v51, %v590_v21  ;;  %v1962_v10 = vld [vmem:[#allocation63_spill] sm:$0xff] }
  0xed   :  { %1037 = vst [vmem:[#allocation5 + $0x270] sm:$0xff] %v922_v9  ;;  %v474_v30 = vadd.f32 %v1514_v41, %v325_v4  ;;  %v586_v11 = vmul.f32 0.2, %v472_v47  ;;  %1038 = vst [vmem:[#allocation5 + $0x278] sm:$0xff] %v923_v52  ;;  %v705_v12 = vmax.f32 %v477_v62, %v591_v6  ;;  %v481_v35 = vadd.f32 %v1506_v38, %v340_v48  ;;  %v1964_v62 = vld [vmem:[#allocation65_spill] sm:$0xff]  ;;  %v360_v6 = vpop.permute.xlu1 %359 }
  0xee   :  { %v931_v58 = vmul.f32 %v1956_v31, %v703_v2  ;;  %v587_v59 = vmul.f32 0.2, %v473_v3  ;;  %1039 = vst.msk [vmem:[#allocation5 + $0x280] sm:$0xff] %vm960_vm0, %v924_v7  ;;  %v932_v15 = vmul.f32 %v1957_v14, %v704_v57  ;;  %v482_v36 = vadd.f32 %v1510_v49, %v340_v48  ;;  %v1966_v2 = vld [vmem:[#allocation67_spill] sm:$0xff] }
  0xef   :  { %v588_v26 = vmul.f32 0.2, %v474_v30  ;;  %v700_v39 = vmax.f32 %v472_v47, %v586_v11  ;;  %v933_v13 = vmul.f32 %v1958_v27, %v705_v12  ;;  %v483_v16 = vadd.f32 %v1514_v41, %v340_v48  ;;  %v1965_v47 = vld [vmem:[#allocation66_spill] sm:$0xff] }
  0xf0   :  { %1046 = vst [vmem:[#allocation5 + $0x2b8] sm:$0xff] %v931_v58  ;;  %v701_v17 = vmax.f32 %v473_v3, %v587_v59  ;;  %v595_v40 = vmul.f32 0.2, %v481_v35  ;;  %1047 = vst [vmem:[#allocation5 + $0x2c0] sm:$0xff] %v932_v15  ;;  %v596_v8 = vmul.f32 0.2, %v482_v36  ;;  %v478_v28 = vadd.f32 %v1506_v38, %v335_v63 }
  0xf1   :  { %v702_v37 = vmax.f32 %v474_v30, %v588_v26  ;;  %v928_v45 = vmul.f32 %v1959_v42, %v700_v39  ;;  %1048 = vst.msk [vmem:[#allocation5 + $0x2c8] sm:$0xff] %vm960_vm0, %v933_v13  ;;  %v597_v60 = vmul.f32 0.2, %v483_v16  ;;  %v479_v46 = vadd.f32 %v1510_v49, %v335_v63  ;;  %v1967_v30 = vld [vmem:[#allocation68_spill] sm:$0xff]  ;;  %v355_v26 = vpop.permute.xlu0 %354  ;;  %v1969_v39 = vld [vmem:[#allocation70_spill] sm:$0xff] }
  0xf2   :  { %v929_v34 = vmul.f32 %v1960_v44, %v701_v17  ;;  %v709_v61 = vmax.f32 %v481_v35, %v595_v40  ;;  %v710_v50 = vmax.f32 %v482_v36, %v596_v8  ;;  %v480_v56 = vadd.f32 %v1514_v41, %v335_v63  ;;  %v1968_v35 = vld [vmem:[#allocation69_spill] sm:$0xff] }
  0xf3   :  { %v930_v20 = vmul.f32 %v1961_v32, %v702_v37  ;;  %1043 = vst [vmem:[#allocation5 + $0x2a0] sm:$0xff] %v928_v45  ;;  %v592_v18 = vmul.f32 0.2, %v478_v28  ;;  %v711_v19 = vmax.f32 %v483_v16, %v597_v60  ;;  %v593_v54 = vmul.f32 0.2, %v479_v46  ;;  %v1970_v16 = vld [vmem:[#allocation71_spill] sm:$0xff]  ;;  %v370_v60 = vpop.permute.xlu1 %369 }
  0xf4   :  { %1044 = vst [vmem:[#allocation5 + $0x2a8] sm:$0xff] %v929_v34  ;;  %v937_v4 = vmul.f32 %v1962_v10, %v709_v61  ;;  %v487_v0 = vadd.f32 %v1506_v38, %v350_v43  ;;  %v938_v51 = vmul.f32 %v1963_v33, %v710_v50  ;;  %v594_v55 = vmul.f32 0.2, %v480_v56  ;;  %v1972_v61 = vld [vmem:[#allocation73_spill] sm:$0xff] }
  0xf5   :  { %1045 = vst.msk [vmem:[#allocation5 + $0x2b0] sm:$0xff] %vm960_vm0, %v930_v20  ;;  %v706_v24 = vmax.f32 %v478_v28, %v592_v18  ;;  %v488_v1 = vadd.f32 %v1510_v49, %v350_v43  ;;  %v939_v25 = vmul.f32 %v1964_v62, %v711_v19  ;;  %v707_v29 = vmax.f32 %v479_v46, %v593_v54  ;;  %v1971_v28 = vld [vmem:[#allocation72_spill] sm:$0xff] }
  0xf6   :  { %1052 = vst [vmem:[#allocation5 + $0x2e8] sm:$0xff] %v937_v4  ;;  %v489_v5 = vadd.f32 %v1514_v41, %v350_v43  ;;  %v601_v9 = vmul.f32 0.2, %v487_v0  ;;  %1053 = vst [vmem:[#allocation5 + $0x2f0] sm:$0xff] %v938_v51  ;;  %v708_v21 = vmax.f32 %v480_v56, %v594_v55  ;;  %v484_v52 = vadd.f32 %v1506_v38, %v345_v23  ;;  %v1973_v56 = vld [vmem:[#allocation74_spill] sm:$0xff]  ;;  %v365_v55 = vpop.permute.xlu0 %364 }
  0xf7   :  { %v934_v48 = vmul.f32 %v1965_v47, %v706_v24  ;;  %v602_v22 = vmul.f32 0.2, %v488_v1  ;;  %1054 = vst.msk [vmem:[#allocation5 + $0x2f8] sm:$0xff] %vm960_vm0, %v939_v25  ;;  %v935_v3 = vmul.f32 %v1966_v2, %v707_v29  ;;  %v485_v57 = vadd.f32 %v1510_v49, %v345_v23  ;;  %v1975_v24 = vld [vmem:[#allocation76_spill] sm:$0xff] }
  0xf8   :  { %v603_v53 = vmul.f32 0.2, %v489_v5  ;;  %v715_v7 = vmax.f32 %v487_v0, %v601_v9  ;;  %v936_v11 = vmul.f32 %v1967_v30, %v708_v21  ;;  %v486_v31 = vadd.f32 %v1514_v41, %v345_v23  ;;  %v1974_v0 = vld [vmem:[#allocation75_spill] sm:$0xff] }
  0xf9   :  { %1049 = vst [vmem:[#allocation5 + $0x2d0] sm:$0xff] %v934_v48  ;;  %v716_v12 = vmax.f32 %v488_v1, %v602_v22  ;;  %v598_v58 = vmul.f32 0.2, %v484_v52  ;;  %1050 = vst [vmem:[#allocation5 + $0x2d8] sm:$0xff] %v935_v3  ;;  %v599_v14 = vmul.f32 0.2, %v485_v57  ;;  %v493_v15 = vadd.f32 %v1506_v38, %v360_v6 }
  0xfa   :  { %v717_v59 = vmax.f32 %v489_v5, %v603_v53  ;;  %v943_v63 = vmul.f32 %v1968_v35, %v715_v7  ;;  %1051 = vst.msk [vmem:[#allocation5 + $0x2e0] sm:$0xff] %vm960_vm0, %v936_v11  ;;  %v600_v27 = vmul.f32 0.2, %v486_v31  ;;  %v494_v17 = vadd.f32 %v1510_v49, %v360_v6  ;;  %v1976_v5 = vld [vmem:[#allocation77_spill] sm:$0xff]  ;;  %v1978_v7 = vld [vmem:[#allocation79_spill] sm:$0xff] }
  0xfb   :  { %v944_v36 = vmul.f32 %v1969_v39, %v716_v12  ;;  %v712_v13 = vmax.f32 %v484_v52, %v598_v58  ;;  %v713_v37 = vmax.f32 %v485_v57, %v599_v14  ;;  %v495_v42 = vadd.f32 %v1514_v41, %v360_v6  ;;  %v1977_v52 = vld [vmem:[#allocation78_spill] sm:$0xff]  ;;  %v177_v3 = vld [vmem:[#allocation2 + $0x368] sm:$0xff]  ;;  %v1979_v58 = vld [vmem:[#allocation80_spill] sm:$0xff] }
  0xfc   :  { %v945_v40 = vmul.f32 %v1970_v16, %v717_v59  ;;  %1058 = vst [vmem:[#allocation5 + $0x318] sm:$0xff] %v943_v63  ;;  %v607_v45 = vmul.f32 0.2, %v493_v15  ;;  %v714_v8 = vmax.f32 %v486_v31, %v600_v27  ;;  %v608_v44 = vmul.f32 0.2, %v494_v17  ;;  %v178_v12 = vld [vmem:[#allocation2 + $0x370] sm:$0xff] }
  0xfd   :  { %1059 = vst [vmem:[#allocation5 + $0x320] sm:$0xff] %v944_v36  ;;  %v940_v43 = vmul.f32 %v1971_v28, %v712_v13  ;;  %v490_v34 = vadd.f32 %v1506_v38, %v355_v26  ;;  %v941_v46 = vmul.f32 %v1972_v61, %v713_v37  ;;  %v609_v32 = vmul.f32 0.2, %v495_v42  ;;  %v1981_v27 = vld [vmem:[#allocation82_spill] sm:$0xff] }
  0xfe   :  { %1060 = vst.msk [vmem:[#allocation5 + $0x328] sm:$0xff] %vm960_vm0, %v945_v40  ;;  %v721_v20 = vmax.f32 %v493_v15, %v607_v45  ;;  %v491_v50 = vadd.f32 %v1510_v49, %v355_v26  ;;  %v942_v18 = vmul.f32 %v1973_v56, %v714_v8  ;;  %v722_v19 = vmax.f32 %v494_v17, %v608_v44  ;;  %v1982_v40 = vld [vmem:[#allocation83_spill] sm:$0xff]  ;;  %v1983_v45 = vld [vmem:[#allocation84_spill] sm:$0xff] }
  0xff   :  { %1055 = vst [vmem:[#allocation5 + $0x300] sm:$0xff] %v940_v43  ;;  %v492_v10 = vadd.f32 %v1514_v41, %v355_v26  ;;  %v604_v4 = vmul.f32 0.2, %v490_v34  ;;  %1056 = vst [vmem:[#allocation5 + $0x308] sm:$0xff] %v941_v46  ;;  %v723_v54 = vmax.f32 %v495_v42, %v609_v32  ;;  %v499_v51 = vadd.f32 %v1506_v38, %v370_v60  ;;  %v1980_v26 = vld [vmem:[#allocation81_spill] sm:$0xff] }
 0x100   :  { %v949_v23 = vmul.f32 %v1974_v0, %v721_v20  ;;  %v605_v33 = vmul.f32 0.2, %v491_v50  ;;  %1057 = vst.msk [vmem:[#allocation5 + $0x310] sm:$0xff] %vm960_vm0, %v942_v18  ;;  %v950_v1 = vmul.f32 %v1975_v24, %v722_v19  ;;  %v500_v29 = vadd.f32 %v1510_v49, %v370_v60 }
 0x101   :  { %v606_v62 = vmul.f32 0.2, %v492_v10  ;;  %v718_v25 = vmax.f32 %v490_v34, %v604_v4  ;;  %v951_v9 = vmul.f32 %v1976_v5, %v723_v54  ;;  %v501_v47 = vadd.f32 %v1514_v41, %v370_v60 }
 0x102   :  { %1064 = vst [vmem:[#allocation5 + $0x348] sm:$0xff] %v949_v23  ;;  %v719_v21 = vmax.f32 %v491_v50, %v605_v33  ;;  %v613_v48 = vmul.f32 0.2, %v499_v51  ;;  %1065 = vst [vmem:[#allocation5 + $0x350] sm:$0xff] %v950_v1  ;;  %v614_v2 = vmul.f32 0.2, %v500_v29  ;;  %v496_v53 = vadd.f32 %v1506_v38, %v365_v55 }
 0x103   :  { %v720_v22 = vmax.f32 %v492_v10, %v606_v62  ;;  %v946_v6 = vmul.f32 %v1977_v52, %v718_v25  ;;  %1066 = vst.msk [vmem:[#allocation5 + $0x358] sm:$0xff] %vm960_vm0, %v951_v9  ;;  %v615_v30 = vmul.f32 0.2, %v501_v47  ;;  %v497_v31 = vadd.f32 %v1510_v49, %v365_v55 }
 0x104   :  { %v947_v57 = vmul.f32 %v1978_v7, %v719_v21  ;;  %v727_v11 = vmax.f32 %v499_v51, %v613_v48  ;;  %v728_v35 = vmax.f32 %v500_v29, %v614_v2  ;;  %v498_v63 = vadd.f32 %v1514_v41, %v365_v55 }
 0x105   :  { %v948_v59 = vmul.f32 %v1979_v58, %v720_v22  ;;  %1061 = vst [vmem:[#allocation5 + $0x330] sm:$0xff] %v946_v6  ;;  %v610_v14 = vmul.f32 0.2, %v496_v53  ;;  %v729_v15 = vmax.f32 %v501_v47, %v615_v30  ;;  %v839_v39 = vadd.f32 1.0, %v177_v3 }
 0x106   :  { %1062 = vst [vmem:[#allocation5 + $0x338] sm:$0xff] %v947_v57  ;;  %v955_v38 = vmul.f32 %v1980_v26, %v727_v11  ;;  %v611_v36 = vmul.f32 0.2, %v497_v31  ;;  %v956_v13 = vmul.f32 %v1981_v27, %v728_v35  ;;  %v840_v17 = vadd.f32 1.0, %v178_v12 }
 0x107   :  { %1063 = vst.msk [vmem:[#allocation5 + $0x340] sm:$0xff] %vm960_vm0, %v948_v59  ;;  %v612_v16 = vmul.f32 0.2, %v498_v63  ;;  %v724_v49 = vmax.f32 %v496_v53, %v610_v14  ;;  %v957_v37 = vmul.f32 %v1982_v40, %v729_v15 }
 0x108   :  { %1070 = vst [vmem:[#allocation5 + $0x378] sm:$0xf] %v955_v38  ;;  %v725_v42 = vmax.f32 %v497_v31, %v611_v36  ;;  %1071 = vst [vmem:[#allocation5 + $0x380] sm:$0xf] %v956_v13 }
 0x109   :  { %v726_v41 = vmax.f32 %v498_v63, %v612_v16  ;;  %v952_v8 = vmul.f32 %v1983_v45, %v724_v49  ;;  %1073 = vst.msk [vmem:[#allocation5 + $0x388] sm:$0xf] %vm1072_vm1, %v957_v37 }
 0x10a   :  { %v953_v28 = vmul.f32 %v839_v39, %v725_v42 }
 0x10b   :  { %v954_v43 = vmul.f32 %v840_v17, %v726_v41  ;;  %1067 = vst [vmem:[#allocation5 + $0x360] sm:$0xff] %v952_v8 }
 0x10c   :  { %1068 = vst [vmem:[#allocation5 + $0x368] sm:$0xff] %v953_v28 }
 0x10d   :  { %1069 = vst.msk [vmem:[#allocation5 + $0x370] sm:$0xff] %vm960_vm0, %v954_v43 }
 0x10e   :  { %1131 = shalt.err (!%p1128_p12)
}
 0x10f   :  { %s1132_s29 = scalar_lea.hbm %s1826_s3, 14592 }
 0x110   :  { %p1133_p13 = scmp.ne.s32.totalorder %s1826_s3, %s1132_s29  ;;  %p1136_p0 = scmp.lt.u32.totalorder %s1132_s29, %s1826_s3 }
 0x112   :  { %p1138_p1 = pnand %p1136_p0, %p1133_p13 }
 0x114   :  { %1141 = shalt.err (!%p1138_p1)
}
 0x115   :  { %1085 = dma.vmem_to_hbm [thread:$0]  %s1080_s25, 14592, %s1826_s3, [#allocation4], %s1147_s22, %s1147_s22, %s1148_s23  }
 0x116   :  { %1144 = dma.done.wait [#allocation4], 14592  }
 0x117   :  { %1145 = vsyncadd [#allocation4], 4294952704 }
 0x118   :  { %1089 = vsyncpa [#allocation3], 1 }
 0x119   :  { %1090 = vsyncpa [#allocation4], 1 }

</bundles_post_ra>
